<compile_context>
chip_gen: v5e
topology: v5e:2x2
jax: 0.10.0
libtpu: 0.0.40
codegen_flags: <defaults>
</compile_context>

<pallas_src>
import jax
import jax.numpy as jnp
import numpy as np
from jax.experimental import pallas as pl
from jax.experimental.pallas import tpu as pltpu


# --------------------------------------------------------------------------
# Reconstruction term:  mean_b [ sum_pixels mean_samples ( -BCEWithLogits ) ]
#
#   -bce = x*y - max(x,0) - log1p(exp(-|x|))        (x = logits, y = target)
#   sum over everything, then scale by 1/(S*bs) in the wrapper.
# --------------------------------------------------------------------------

_VMEM_BUDGET = 24 * 1024 * 1024     # conservative vs v7x's 32 MiB scoped VMEM
_VMEM_LIMIT = 32 * 1024 * 1024      # within physical VMEM on v5e/v6e/v7x
_MAX_ROW_BLOCK = 2048
_NEG_PAD_LOGIT = -1.0e4             # softplus(-1e4) == 0 exactly in f32
_KL_PALLAS_MIN_BYTES = 2 * 1024 * 1024


def _recon_kernel(vid_ref, logits_ref, e_ref, pos_ref, neg_ref):
    r = pl.program_id(1)

    @pl.when(r == 0)
    def _():
        pos_ref[...] = jnp.zeros_like(pos_ref)
        neg_ref[...] = jnp.zeros_like(neg_ref)

    x_raw = logits_ref[...]                      # (R, p_lane), producer dtype
    x = x_raw.astype(jnp.float32)                # f32 math (v5e-safe)
    y = vid_ref[...].astype(jnp.float32)         # (R, p_pix)

    # Stable softplus piece of -BCEWithLogits.
    # TODO(synk): on v6e/v7x the exp/log1p pair could run in bf16 on the EUP
    # if the kernel ever becomes EUP-bound; kept f32 for accuracy parity.
    softplus = jnp.maximum(x, 0.0) + jnp.log1p(jnp.exp(-jnp.abs(x)))  # (R, p_lane)

    # Per-pixel sum over the S samples via MXU (constant 0/1 matrix) -> the
    # video never has to be broadcast over the sample axis.
    xs = jnp.dot(x_raw, e_ref[...], preferred_element_type=jnp.float32)  # (R, p_pix)
    contrib = xs * y                                                      # (R, p_pix)

    # vreg-block partial sums: (R, L) -> (R//8, 8, L) is a free metadata
    # reshape, and summing the leading axis is pure VALU vreg adds.  The one
    # cross-lane collapse happens in the wrapper, once.
    R, L = softplus.shape
    neg_ref[...] += softplus.reshape(R // 8, 8, L).sum(axis=0)
    _, Lp = contrib.shape
    pos_ref[...] += contrib.reshape(R // 8, 8, Lp).sum(axis=0)


def _pick_row_block(rows_per_group, max_rows):
    """Largest row block dividing rows_per_group, multiple of 8 (preferring
    MXU-friendly 256 / 128), capped at max_rows."""
    if rows_per_group <= max_rows:
        return rows_per_group
    for align in (256, 128, 8):
        cand = (max_rows // align) * align
        while cand >= align:
            if rows_per_group % cand == 0:
                return cand
            cand -= align
    return rows_per_group   # unreachable when rows_per_group % 8 == 0


def recon_pallas(vid_batch, p_theta_logits):
    bs, N, d, _, S = p_theta_logits.shape
    rows = bs * N
    p_pix = d * d
    p_lane = p_pix * S                           # lane axis, multiple of 128 here

    # Contiguous (free) reshapes of the native layouts -- no HBM transpose.
    logits2d = p_theta_logits.reshape(rows, p_lane)
    vid2d = vid_batch.reshape(rows, p_pix)
    if logits2d.dtype.itemsize <= 2:
        # Binary (0/1) video is exact in bf16 -> halves the video DMA bytes.
        vid2d = vid2d.astype(logits2d.dtype)

    # Pad rows to a sublane multiple; padded logits are very negative so both
    # the softplus and the x*y contributions of padded rows are exactly zero.
    pad = (-rows) % 8
    if pad:
        logits2d = jnp.concatenate(
            [logits2d, jnp.full((pad, p_lane), _NEG_PAD_LOGIT, logits2d.dtype)], 0)
        vid2d = jnp.concatenate(
            [vid2d, jnp.zeros((pad, p_pix), vid2d.dtype)], 0)
    rows_p = rows + pad

    # Two row groups on a leading "parallel" axis: v7x's two TensorCores each
    # sweep half the rows; on single-TC v5e/v6e it is a cheap sequential no-op.
    num_groups = 2 if rows_p % 16 == 0 else 1
    rows_per_group = rows_p // num_groups

    # Constant sample-sum matrix E[p*S + s, p] = 1, in the logits dtype.
    e_mat = jnp.asarray(np.repeat(np.eye(p_pix, dtype=np.float32), S, axis=0),
                        dtype=logits2d.dtype)

    # --- explicit VMEM byte budget (v7x 64 MiB physical is the tight case) --
    l_item = logits2d.dtype.itemsize
    v_item = vid2d.dtype.itemsize
    e_bytes = p_lane * p_pix * l_item
    out_bytes = num_groups * 8 * (p_lane + p_pix) * 4
    fixed = 2 * e_bytes + 2 * out_bytes
    per_row = 2 * (p_lane * l_item + p_pix * v_item)     # double-buffered tiles
    # TODO(synk): for large d*S the dense E matrix should be fed band-by-band
    # via a pixel-column grid axis instead of kept fully resident in VMEM.
    assert fixed + 8 * per_row <= _VMEM_BUDGET, (
        "recon working set exceeds VMEM budget; tile E over pixel columns")
    max_rows_vmem = max(8, ((_VMEM_BUDGET - fixed) // per_row) // 8 * 8)
    r_blk = _pick_row_block(rows_per_group, min(_MAX_ROW_BLOCK, max_rows_vmem))
    blocks_per_group = rows_per_group // r_blk

    cost = pl.CostEstimate(
        flops=int(2 * rows_p * p_lane * p_pix + 6 * rows_p * p_lane),
        transcendentals=int(2 * rows_p * p_lane),
        bytes_accessed=int(rows_p * p_lane * l_item + rows_p * p_pix * v_item
                           + e_bytes + 2 * out_bytes))

    pos, neg = pl.pallas_call(
        _recon_kernel,
        out_shape=(jax.ShapeDtypeStruct((num_groups * 8, p_pix), jnp.float32),
                   jax.ShapeDtypeStruct((num_groups * 8, p_lane), jnp.float32)),
        grid_spec=pltpu.PrefetchScalarGridSpec(
            num_scalar_prefetch=0,
            grid=(num_groups, blocks_per_group),
            in_specs=[
                pl.BlockSpec((r_blk, p_pix),
                             lambda c, r: (c * blocks_per_group + r, 0)),
                pl.BlockSpec((r_blk, p_lane),
                             lambda c, r: (c * blocks_per_group + r, 0)),
                pl.BlockSpec((p_lane, p_pix), lambda c, r: (0, 0)),  # constant
            ],
            out_specs=[
                pl.BlockSpec((8, p_pix), lambda c, r: (c, 0)),
                pl.BlockSpec((8, p_lane), lambda c, r: (c, 0)),
            ],
        ),
        compiler_params=pltpu.CompilerParams(
            dimension_semantics=("parallel", "arbitrary"),
            vmem_limit_bytes=_VMEM_LIMIT),
        cost_estimate=cost,
    )(vid2d, logits2d, e_mat)

    # mean over samples and mean over batch are linear -> one scalar scale.
    total = jnp.sum(pos) - jnp.sum(neg)
    return total / (S * bs)


# --------------------------------------------------------------------------
# KL divergence term (Cholesky-based, as in the PyTorch module):
#   kl_b = 0.5 * ( ||W_b||_F^2 - N*m + ||w_b||^2
#                  + 2*(sum log diag L_post_b - sum log diag L_prior) )
# with  W = L_post^-1 L_prior   and   w = L_post^-1 (mu_post - mu_prior).
# --------------------------------------------------------------------------
def _kl_kernel(wsq_ref, wv_ref, dpost_ref, out_ref):
    step = pl.program_id(0)

    @pl.when(step == 0)
    def _():
        wv = wv_ref[...].astype(jnp.float32)       # (bs, MN)
        dp = dpost_ref[...].astype(jnp.float32)    # (bs, MN) diag of L_post
        out_ref[...] = jnp.zeros_like(out_ref) + (
            jnp.sum(wv * wv) + 2.0 * jnp.sum(jnp.log(dp)))

    wsq = wsq_ref[...].astype(jnp.float32)         # (bs, lane tile) view of W
    out_ref[...] = out_ref[...] + jnp.sum(wsq * wsq)


def _pick_lane_block(cols, max_cols):
    if cols <= max_cols:
        return cols
    cand = (max_cols // 128) * 128
    while cand >= 128:
        if cols % cand == 0:
            return cand
        cand -= 128
    # TODO(synk): no lane-aligned divisor of MN*MN; falls back to one block.
    return cols


def _kl_factors(mean_post, covar_post, mean_prior, covar_prior):
    """Shared glue: Cholesky + triangular solves."""
    bs, N, m = mean_post.shape
    MN = m * N
    # TODO(synk): torch.linalg.cholesky / cholesky_solve are sequential
    # factorizations with no clean Pallas equivalent; kept as plain-JAX glue.
    L_prior = jnp.linalg.cholesky(covar_prior)                        # (MN, MN)
    L_post = jnp.linalg.cholesky(covar_post)                          # (bs, MN, MN)

    W = jax.scipy.linalg.solve_triangular(
        L_post, jnp.broadcast_to(L_prior, (bs, MN, MN)), lower=True)  # (bs, MN, MN)

    # matches torch: transpose(1,2).reshape(bs, m*N)
    mp = jnp.transpose(mean_post, (0, 2, 1)).reshape(bs, MN)
    mpri = jnp.transpose(mean_prior, (1, 0)).reshape(MN)
    delta = mp - mpri[None, :]                                        # (bs, MN)
    wv = jax.scipy.linalg.solve_triangular(
        L_post, delta[..., None], lower=True)[..., 0]                 # (bs, MN)

    dpost = jnp.diagonal(L_post, axis1=1, axis2=2)                    # (bs, MN)
    dprior = jnp.diagonal(L_prior)                                    # (MN,)
    return W, wv, dpost, dprior, MN


def kl_divergence(mean_post, covar_post, mean_prior, covar_prior,
                  use_pallas=None):
    bs = mean_post.shape[0]
    W, wv, dpost, dprior, MN = _kl_factors(
        mean_post, covar_post, mean_prior, covar_prior)

    # Batch-invariant -> hoisted out of the kernel.
    logdet_prior = jnp.sum(jnp.log(dprior))

    wsq_bytes = bs * MN * MN * 4
    if use_pallas is None:
        # At small sizes the pallas_call fixed cost + extra HBM round trip of
        # W dominate; let XLA fuse the reductions with the triangular solves.
        use_pallas = wsq_bytes >= _KL_PALLAS_MIN_BYTES

    if use_pallas:
        wsq = W.reshape(bs, MN * MN).astype(jnp.float32)   # lane-dense view
        wv2 = wv.astype(jnp.float32)
        dp2 = dpost.astype(jnp.float32)

        cols = MN * MN
        max_cols = max(128, (_VMEM_BUDGET // (2 * bs * 4)) // 128 * 128)
        t_cols = _pick_lane_block(cols, max_cols)
        n_blocks = cols // t_cols

        cost = pl.CostEstimate(
            flops=int(2 * wsq.size + 2 * wv2.size + 3 * dp2.size),
            transcendentals=int(dp2.size),
            bytes_accessed=int(4 * (wsq.size + wv2.size + dp2.size) + 4))

        total = pl.pallas_call(
            _kl_kernel,
            out_shape=jax.ShapeDtypeStruct((1, 1), jnp.float32),
            grid_spec=pltpu.PrefetchScalarGridSpec(
                num_scalar_prefetch=0,
                grid=(n_blocks,),
                in_specs=[
                    pl.BlockSpec((bs, t_cols), lambda i: (0, i)),
                    pl.BlockSpec((bs, MN), lambda i: (0, 0)),
                    pl.BlockSpec((bs, MN), lambda i: (0, 0)),
                ],
                out_specs=pl.BlockSpec((1, 1), lambda i: (0, 0)),
            ),
            compiler_params=pltpu.CompilerParams(
                dimension_semantics=("arbitrary",),
                vmem_limit_bytes=_VMEM_LIMIT),
            cost_estimate=cost,
        )(wsq, wv2, dp2)[0, 0]
    else:
        total = (jnp.sum(jnp.square(W)) + jnp.sum(jnp.square(wv))
                 + 2.0 * jnp.sum(jnp.log(dpost)))

    kl_sum = 0.5 * (total - bs * MN - 2.0 * bs * logdet_prior)
    return kl_sum / bs


# --------------------------------------------------------------------------
# ELBO.forward
# --------------------------------------------------------------------------
def elbo_forward(weights, vid_batch, p_theta_logits,
                 mean_prior, covar_prior, mean_post, covar_post):
    recon_obj = weights[0] * recon_pallas(vid_batch, p_theta_logits)
    kl_obj = -weights[1] * kl_divergence(
        mean_post, covar_post, mean_prior, covar_prior)
    return recon_obj + kl_obj


# Pure-JAX references.
def kl_reference(mean_post, covar_post, mean_prior, covar_prior):
    W, wv, dpost, dprior, MN = _kl_factors(
        mean_post, covar_post, mean_prior, covar_prior)
    term1 = jnp.sum(W * W, axis=(1, 2))
    term3 = jnp.sum(wv * wv, axis=1)
    term4 = 2.0 * (jnp.sum(jnp.log(dpost), axis=1) - jnp.sum(jnp.log(dprior)))
    return (0.5 * (term1 - MN + term3 + term4)).mean()


def elbo_reference(weights, vid_batch, p_theta_logits,
                   mean_prior, covar_prior, mean_post, covar_post):
    x = p_theta_logits.astype(jnp.float32)
    y = vid_batch.astype(jnp.float32)[..., None]
    bce = jnp.maximum(x, 0.0) - x * y + jnp.log1p(jnp.exp(-jnp.abs(x)))
    recon = (-bce).mean(axis=4).sum(axis=(1, 2, 3)).mean()
    kl = kl_reference(mean_post, covar_post, mean_prior, covar_prior)
    return weights[0] * recon - weights[1] * kl


if __name__ == "__main__":
    bs, N, d, m, S = 2, 8, 16, 4, 4
    MN = m * N

    key = jax.random.PRNGKey(0)
    k1, k2, k3, k4, k5, k6 = jax.random.split(key, 6)

    vid_batch = (jax.random.uniform(k1, (bs, N, d, d)) < 0.5).astype(jnp.float32)
    # Producer emits bf16 logits -> halved DMA for the dominant recon input.
    p_theta_logits = jax.random.normal(
        k2, (bs, N, d, d, S), dtype=jnp.float32).astype(jnp.bfloat16)
    mean_prior = jax.random.normal(k3, (N, m), dtype=jnp.float32)
    mean_post = jax.random.normal(k4, (bs, N, m), dtype=jnp.float32)

    A = 0.1 * jax.random.normal(k5, (MN, MN), dtype=jnp.float32)
    covar_prior = A @ A.T + 0.5 * jnp.eye(MN, dtype=jnp.float32)
    B = 0.1 * jax.random.normal(k6, (bs, MN, MN), dtype=jnp.float32)
    covar_post = (jnp.einsum("bij,bkj->bik", B, B)
                  + 0.5 * jnp.eye(MN, dtype=jnp.float32)[None])

    weights = jnp.array([1.0, 0.5], dtype=jnp.float32)  # deterministic "parameters"

    elbo = jax.block_until_ready(
        elbo_forward(weights, vid_batch, p_theta_logits,
                     mean_prior, covar_prior, mean_post, covar_post))

    ref = jax.block_until_ready(
        elbo_reference(weights, vid_batch, p_theta_logits,
                       mean_prior, covar_prior, mean_post, covar_post))

    np.testing.assert_allclose(np.asarray(elbo), np.asarray(ref),
                               rtol=1e-3, atol=1e-2)

    # Also exercise the Pallas KL reduction path (the size heuristic routes
    # the tiny demo problem to the fused-XLA path by default).
    kl_p = jax.block_until_ready(
        kl_divergence(mean_post, covar_post, mean_prior, covar_prior,
                      use_pallas=True))
    kl_r = jax.block_until_ready(
        kl_reference(mean_post, covar_post, mean_prior, covar_prior))
    np.testing.assert_allclose(np.asarray(kl_p), np.asarray(kl_r),
                               rtol=1e-4, atol=1e-4)

    print("KERNEL_OK")
</pallas_src>

<mosaic_0001>
module attributes {stable_mosaic.version = 11 : i64} {
  func.func @_recon_kernel(%arg0: i32, %arg1: i32, %arg2: memref<8x256xbf16, #tpu.memory_space<vmem>>, %arg3: memref<8x1024xbf16, #tpu.memory_space<vmem>>, %arg4: memref<1024x256xbf16, #tpu.memory_space<vmem>>, %arg5: memref<8x256xf32, #tpu.memory_space<vmem>>, %arg6: memref<8x1024xf32, #tpu.memory_space<vmem>>) attributes {dimension_semantics = [#tpu.dimension_semantics<parallel>, #tpu.dimension_semantics<arbitrary>], iteration_bounds = array<i64: 2, 1>, scalar_prefetch = 0 : i64, scratch_operands = 0 : i64, tpu.core_type = #tpu.core_type<tc>, window_params = [{transform_indices = @transform_0, window_bounds = array<i64: 8, 256>}, {transform_indices = @transform_1, window_bounds = array<i64: 8, 1024>}, {pipeline_mode = #tpu.pipeline_mode<synchronous>, transform_indices = @transform_2, window_bounds = array<i64: 1024, 256>}, {transform_indices = @transform_3, window_bounds = array<i64: 8, 256>}, {transform_indices = @transform_4, window_bounds = array<i64: 8, 1024>}]} {
    %c0_i32 = arith.constant 0 : i32
    %0 = arith.cmpi eq, %arg1, %c0_i32 : i32
    %1 = arith.extui %0 : i1 to i32
    %c0_i32_0 = arith.constant 0 : i32
    %2 = arith.cmpi ne, %1, %c0_i32_0 : i32
    scf.if %2 {
      %cst_18 = arith.constant 0.000000e+00 : f32
      %28 = vector.broadcast %cst_18 : f32 to vector<8x256xf32>
      %c0_19 = arith.constant 0 : index
      %c0_20 = arith.constant 0 : index
      %29 = vector.load %arg5[%c0_19, %c0_20] : memref<8x256xf32, #tpu.memory_space<vmem>>, vector<8x256xf32>
      tpu.vector_store %arg5[%c0_19, %c0_20], %28 {strides = array<i32>} : memref<8x256xf32, #tpu.memory_space<vmem>>, vector<8x256xf32>,
      %cst_21 = arith.constant 0.000000e+00 : f32
      %30 = vector.broadcast %cst_21 : f32 to vector<8x1024xf32>
      %c0_22 = arith.constant 0 : index
      %c0_23 = arith.constant 0 : index
      %31 = vector.load %arg6[%c0_22, %c0_23] : memref<8x1024xf32, #tpu.memory_space<vmem>>, vector<8x1024xf32>
      tpu.vector_store %arg6[%c0_22, %c0_23], %30 {strides = array<i32>} : memref<8x1024xf32, #tpu.memory_space<vmem>>, vector<8x1024xf32>,
    } else {
    }
    %c0 = arith.constant 0 : index
    %c0_1 = arith.constant 0 : index
    %3 = vector.load %arg3[%c0, %c0_1] : memref<8x1024xbf16, #tpu.memory_space<vmem>>, vector<8x1024xbf16>
    %4 = arith.extf %3 : vector<8x1024xbf16> to vector<8x1024xf32>
    %c0_2 = arith.constant 0 : index
    %c0_3 = arith.constant 0 : index
    %5 = vector.load %arg2[%c0_2, %c0_3] : memref<8x256xbf16, #tpu.memory_space<vmem>>, vector<8x256xbf16>
    %6 = arith.extf %5 : vector<8x256xbf16> to vector<8x256xf32>
    %cst = arith.constant 0.000000e+00 : f32
    %7 = vector.broadcast %cst : f32 to vector<8x1024xf32>
    %8 = arith.maximumf %4, %7 : vector<8x1024xf32>
    %9 = math.absf %4 : vector<8x1024xf32>
    %cst_4 = arith.constant 0.000000e+00 : f32
    %10 = vector.broadcast %cst_4 : f32 to vector<8x1024xf32>
    %11 = arith.subf %10, %9 : vector<8x1024xf32>
    %12 = math.exp %11 : vector<8x1024xf32>
    %13 = math.log1p %12 : vector<8x1024xf32>
    %14 = arith.addf %8, %13 : vector<8x1024xf32>
    %c0_5 = arith.constant 0 : index
    %c0_6 = arith.constant 0 : index
    %15 = vector.load %arg4[%c0_5, %c0_6] : memref<1024x256xbf16, #tpu.memory_space<vmem>>, vector<1024x256xbf16>
    %cst_7 = arith.constant dense<0.000000e+00> : vector<8x256xf32>
    %16 = tpu.matmul %3, %15, %cst_7 {dimension_numbers = #tpu.dot_dimension_numbers<[1], [0], [0], [1], [0, 0, 1, 1], [], []>} : vector<8x1024xbf16>, vector<1024x256xbf16>, vector<8x256xf32> -> vector<8x256xf32>
    %17 = arith.mulf %16, %6 : vector<8x256xf32>
    %c0_8 = arith.constant 0 : index
    %c0_9 = arith.constant 0 : index
    %18 = vector.load %arg6[%c0_8, %c0_9] : memref<8x1024xf32, #tpu.memory_space<vmem>>, vector<8x1024xf32>
    %19 = vector.shape_cast %14 : vector<8x1024xf32> to vector<1x8x1024xf32>
    %cst_10 = arith.constant dense<0.000000e+00> : vector<8x1024xf32>
    %20 = vector.multi_reduction <add>, %19, %cst_10 [0] : vector<1x8x1024xf32> to vector<8x1024xf32>
    %21 = arith.addf %18, %20 : vector<8x1024xf32>
    %c0_11 = arith.constant 0 : index
    %c0_12 = arith.constant 0 : index
    %22 = vector.load %arg6[%c0_11, %c0_12] : memref<8x1024xf32, #tpu.memory_space<vmem>>, vector<8x1024xf32>
    tpu.vector_store %arg6[%c0_11, %c0_12], %21 {strides = array<i32>} : memref<8x1024xf32, #tpu.memory_space<vmem>>, vector<8x1024xf32>,
    %c0_13 = arith.constant 0 : index
    %c0_14 = arith.constant 0 : index
    %23 = vector.load %arg5[%c0_13, %c0_14] : memref<8x256xf32, #tpu.memory_space<vmem>>, vector<8x256xf32>
    %24 = vector.shape_cast %17 : vector<8x256xf32> to vector<1x8x256xf32>
    %cst_15 = arith.constant dense<0.000000e+00> : vector<8x256xf32>
    %25 = vector.multi_reduction <add>, %24, %cst_15 [0] : vector<1x8x256xf32> to vector<8x256xf32>
    %26 = arith.addf %23, %25 : vector<8x256xf32>
    %c0_16 = arith.constant 0 : index
    %c0_17 = arith.constant 0 : index
    %27 = vector.load %arg5[%c0_16, %c0_17] : memref<8x256xf32, #tpu.memory_space<vmem>>, vector<8x256xf32>
    tpu.vector_store %arg5[%c0_16, %c0_17], %26 {strides = array<i32>} : memref<8x256xf32, #tpu.memory_space<vmem>>, vector<8x256xf32>,
    return
  }
  func.func @transform_0(%arg0: i32, %arg1: i32) -> (i32, i32) {
    %c1_i32 = arith.constant 1 : i32
    %0 = arith.muli %arg0, %c1_i32 : i32
    %1 = arith.addi %0, %arg1 : i32
    %c0_i32 = arith.constant 0 : i32
    %c0_i32_0 = arith.constant 0 : i32
    return %1, %c0_i32 : i32, i32
  }
  func.func @transform_1(%arg0: i32, %arg1: i32) -> (i32, i32) {
    %c1_i32 = arith.constant 1 : i32
    %0 = arith.muli %arg0, %c1_i32 : i32
    %1 = arith.addi %0, %arg1 : i32
    %c0_i32 = arith.constant 0 : i32
    %c0_i32_0 = arith.constant 0 : i32
    return %1, %c0_i32 : i32, i32
  }
  func.func @transform_2(%arg0: i32, %arg1: i32) -> (i32, i32) {
    %c0_i32 = arith.constant 0 : i32
    %c0_i32_0 = arith.constant 0 : i32
    %c0_i32_1 = arith.constant 0 : i32
    return %c0_i32, %c0_i32_0 : i32, i32
  }
  func.func @transform_3(%arg0: i32, %arg1: i32) -> (i32, i32) {
    %c0_i32 = arith.constant 0 : i32
    %c0_i32_0 = arith.constant 0 : i32
    return %arg0, %c0_i32 : i32, i32
  }
  func.func @transform_4(%arg0: i32, %arg1: i32) -> (i32, i32) {
    %c0_i32 = arith.constant 0 : i32
    %c0_i32_0 = arith.constant 0 : i32
    return %arg0, %c0_i32 : i32, i32
  }
}

</mosaic_0001>

<bundles_post_ra>
// kernel: tpu_custom_call.1
= control target key start
LH: loop header
LB: loop body
LE: loop exit
PB: predicated region body
PF: predicated region fallthrough
CT: control target
= control target key end

     0   :  { %s3348_s0 = inlined_call_operand.hbm [shape: bf16[16,256], index: 0, kind: input, shape index: {}]   ;;  %s3349_s1 = inlined_call_operand.hbm [shape: bf16[16,1024], index: 1, kind: input, shape index: {}]   ;;  %s3350_s2 = inlined_call_operand.hbm [shape: bf16[1024,256], index: 2, kind: input, shape index: {}]   ;;  %s3351_s3 = inlined_call_operand.hbm [shape: f32[16,256], index: 3, kind: output, shape index: {0}]   ;;  %s3352_s4 = inlined_call_operand.hbm [shape: f32[16,1024], index: 4, kind: output, shape index: {1}]  }
   0x1   :  { %3361 = sst [smem:[#allocation26_spill]] %s3350_s2 }
   0x2   :  { %10 = vsyncpa [#allocation3], 0 }
   0x3   :  { %12 = vsyncpa [#allocation3 + $0x1], 0 }
   0x4   :  { %13 = vsyncpa [#allocation6], 0 }
   0x5   :  { %15 = vsyncpa [#allocation6 + $0x1], 0 }
   0x6   :  { %16 = vsyncpa [#allocation4], 0 }
   0x7   :  { %18 = vsyncpa [#allocation4 + $0x1], 0 }
   0x8   :  { %19 = vsyncpa [#allocation10], 0 }
   0x9   :  { %21 = vsyncpa [#allocation10 + $0x1], 0  ;;  %s2709_s15 = smov 0   ;;  %s2711_s16 = smov 0  }
   0xa   :  { %s2713_s17 = smov 0   ;;  %s2715_s18 = smov 0  }
   0xb   :  { %s2717_s19 = smov 0   ;;  %s2719_s20 = smov 0  }
   0xc LB: > { %3362 = sst [smem:[#allocation16_spill]] %s2659_s15  ;;  %s2740_s21 = sadd.s32 4294967295, %s2679_s20   ;;  %s2679_s20 = sphi %s2719_s20, %s27_s20   ;;  %s2675_s19 = sphi %s2717_s19, %s3425_s19   ;;  %s2671_s18 = sphi %s2715_s18, %s3424_s18   ;;  %s2667_s17 = sphi %s2713_s17, %s3420_s17   ;;  %s2663_s16 = sphi %s2711_s16, %s3423_s16   ;;  %s2659_s15 = sphi %s2709_s15, %s3422_s15  }
   0xd   : > { %3363 = sst [smem:[#allocation17_spill]] %s2667_s17  ;;  %p1682_p0 = scmp.ge.s32.totalorder %s2679_s20, 1 }
   0xe   : > { %p62_p1 = scmp.eq.s32.totalorder %s2740_s21, 0  ;;  %p173_p2 = scmp.lt.s32.totalorder %s2679_s20, 3 }
   0xf   : > { %s3364_s2 = sld [smem:[#allocation26_spill]]  ;;  %s2681_s26 = smov [#allocation7]  }
  0x10   : > { %p2748_p3 = pnand %p1682_p0, %p173_p2  ;;  %s186_s27 = sshll.u32 %s2681_s26, 4  ;;  %s187_s27 = int_to_ptr.vmem [resolvable:$true] %s186_s27 }
  0x11   : > { %p1684_p6 = scmp.ge.s32.totalorder %s2679_s20, 2  ;;  %s2682_s28 = smov 128  }
  0x12   : > { %p2361_p4 = pneg %p2748_p3  ;;  %s2683_s29 = smov 8  }
  0x13   : > { %s1681_s30 = sadd.s32 4294967294, %s2679_s20   ;;  %s39_s5 = sadd.s32 1, %s2675_s19 }
  0x14   : > { %p2362_p5 = pnand %p2361_p4, %p62_p1  ;;  %s48_s6 = sadd.s32 1, %s2667_s17 }
  0x15   : > { %s184_s24 = sshll.u32 %s3364_s2, 4  ;;  %p41_p7 = scmp.ge.s32.totalorder %s39_s5, 2  ;;  %s185_s24 = int_to_ptr.hbm [resolvable:$true] %s184_s24 }
  0x16   : > { %2364 = dma.hbm_to_vmem [thread:$0]  (!%p2362_p5), %s185_s24, 16384, %s187_s27, [#allocation6], %s2682_s28, %s2682_s28, %s2683_s29  }
  0x17   : > { %p55_p8 = scmp.ne.s32.totalorder %s2667_s17, %s2663_s16  ;;  %p56_p9 = scmp.eq.s32.totalorder %s2679_s20, 0 }
  0x18   : > { %p61_p10 = scmp.ne.s32.totalorder %s2663_s16, %s2659_s15  ;;  %s3427_s5 = smov (%p41_p7, %s39_s5), 0 }
  0x19   : > { %3366 = sst [smem:[#allocation18_spill]] %s3427_s5  ;;  %p2767_p11 = por %p56_p9, %p55_p8 }
  0x1a   : > { %p2773_p12 = por %p62_p1, %p61_p10  ;;  %s45_s9 = ssub.s32 %s2675_s19, %s3427_s5 }
  0x1b   : > { %p134_p13 = scmp.eq.s32.totalorder %s2740_s21, 1  ;;  %p46_p0 = scmp.eq.s32.totalorder %s45_s9, 0 }
  0x1c   : > { %p140_p2 = scmp.eq.s32.totalorder %s1681_s30, 1  ;;  %p2380_p5 = scmp.lt.s32.totalorder %s2679_s20, 2 }
  0x1d   : > { %p2780_p4 = por %p134_p13, %p55_p8  ;;  %s200_s13 = sand.u32 1, %s2667_s17  }
  0x1e   : > { %s2786_s11 = scalar_select %p46_p0, %s2667_s17, %s48_s6  }
  0x1f   : > { %p2788_p7 = por %p140_p2, %p61_p10  ;;  %s1685_s14 = sshll.u32 %s200_s13, 3 }
  0x20   : > { %3370 = sst [smem:[#allocation19_spill]] %s2786_s11  ;;  %s2217_s22 = sshll.u32 %s2675_s19, 3 }
  0x21   : > { %s3371_s12 = scalar_select %p2788_p7, 1, 0 }
  0x22   : > { %s210_s26 = scalar_lea.hbm %s3348_s0, %s2217_s22  ;;  %s204_s27 = scalar_lea.vmem [#allocation2], %s1685_s14 }
  0x23   : > { %3372 = sst [smem:[#allocation20_spill]] %s3371_s12  ;;  %s214_s28 = sshll.u32 %s204_s27, 4  ;;  %s215_s28 = int_to_ptr.vmem [resolvable:$true] %s214_s28 }
  0x24   : > { %s212_s29 = sshll.u32 %s210_s26, 4  ;;  %p2366_p8 = pnand %p2380_p5, %p2767_p11  ;;  %s213_s29 = int_to_ptr.hbm [resolvable:$true] %s212_s29 }
  0x25   : > { %s221_s30 = sand.u32 1, %s2679_s20   ;;  %s1688_s6 = sshll.u32 %s200_s13, 5 }
  0x26   : > { %s201_s9 = scalar_lea.sflag [#allocation3], %s200_s13  ;;  %s2218_s2 = sshll.u32 %s2675_s19, 5 }
  0x27   : > { %2368 = dma.hbm_to_vmem [thread:$0]  (!%p2366_p8), %s213_s29, 128, %s215_s28, %s201_s9  }
  0x28   : > { %s231_s17 = scalar_lea.hbm %s3349_s1, %s2218_s2  ;;  %s225_s12 = scalar_lea.vmem [#allocation5], %s1688_s6 }
  0x29   : > { %s235_s15 = sshll.u32 %s225_s12, 4  ;;  %s233_s23 = sshll.u32 %s231_s17, 4  ;;  %s236_s15 = int_to_ptr.vmem [resolvable:$true] %s235_s15  ;;  %s234_s23 = int_to_ptr.hbm [resolvable:$true] %s233_s23 }
  0x2a   : > { %s222_s14 = scalar_lea.sflag [#allocation6], %s221_s30  ;;  %244 = sbr.rel (%p2748_p3) target bundleno = 332 (0x14c), region = 32 }
  0x2b   : > { %2371 = dma.hbm_to_vmem [thread:$0]  (!%p2366_p8), %s234_s23, 512, %s236_s15, %s222_s14  }
  0x2f   : > { %s2807_s7 = sand.u32 1, %s2663_s16  }
  0x30   : > { %s1692_s13 = sshll.u32 %s2807_s7, 3  ;;  %s247_s22 = scalar_lea.sflag [#allocation3], %s2807_s7 }
  0x31   : > { %s2811_s5 = scalar_lea.vmem [#allocation2], %s1692_s13 }
  0x32   : > { %2638 = dma.done.wait (%p2773_p12), %s247_s22, 128  }
  0x33   : > { %2640 = vsyncadd (%p2773_p12), %s247_s22, 4294967168  ;;  %s256_s2 = sand.u32 1, %s2740_s21   ;;  %s1693_s15 = sshll.u32 %s2807_s7, 5 }
  0x34   : > { %s257_s17 = scalar_lea.sflag [#allocation6], %s256_s2  ;;  %s2819_s25 = scalar_lea.vmem [#allocation5], %s1693_s15 }
  0x35   : > { %2642 = dma.done.wait (%p2773_p12), %s257_s17, 512  }
  0x36   : > { %2644 = vsyncadd (%p2773_p12), %s257_s17, 4294966784 }
  0x37   : > { %2646 = dma.done.wait (%p62_p1), [#allocation6], 16384  }
  0x38   : > { %2648 = vsyncadd (%p62_p1), [#allocation6], 4294950912  ;;  %v1755_v0 = vld [vmem:[#allocation7 + $0x70] sm:$0xf]  ;;  %v2234_v1 = vld [vmem:[#allocation7 + $0x74] sm:$0xf0] }
  0x39   : > { %v1819_v2 = vld [vmem:[#allocation7 + $0xf0] sm:$0xf]  ;;  %v1756_v3 = vor.u32 %v2234_v1, %v1755_v0  ;;  %v2250_v4 = vld [vmem:[#allocation7 + $0xf4] sm:$0xf0]  ;;  %v1747_v11 = vld [vmem:[#allocation7 + $0x60] sm:$0xf] }
  0x3a   : > { %v1883_v5 = vld [vmem:[#allocation7 + $0x170] sm:$0xf]  ;;  %v2266_v6 = vld [vmem:[#allocation7 + $0x174] sm:$0xf0]  ;;  %v1820_v7 = vor.u32 %v2250_v4, %v1819_v2  ;;  %v2232_v13 = vld [vmem:[#allocation7 + $0x64] sm:$0xf0] }
  0x3b   : > { %v1884_v8 = vor.u32 %v2266_v6, %v1883_v5  ;;  %v1947_v9 = vld [vmem:[#allocation7 + $0x1f0] sm:$0xf]  ;;  %v2282_v10 = vld [vmem:[#allocation7 + $0x1f4] sm:$0xf0]  ;;  %1248 = vmatpush.bf16.msra.mxu0 %v1756_v3  ;;  %v1811_v14 = vld [vmem:[#allocation7 + $0xe0] sm:$0xf]  ;;  %v1748_v16 = vor.u32 %v2232_v13, %v1747_v11 }
  0x3c   : > { %v1948_v12 = vor.u32 %v2282_v10, %v1947_v9  ;;  %v2248_v15 = vld [vmem:[#allocation7 + $0xe4] sm:$0xf0]  ;;  %1261 = vmatpush.bf16.msra.mxu1 %v1820_v7  ;;  %v1875_v18 = vld [vmem:[#allocation7 + $0x160] sm:$0xf]  ;;  %v1739_v23 = vld [vmem:[#allocation7 + $0x50] sm:$0xf] }
  0x3d   : > { %1274 = vmatpush.bf16.msra.mxu2 %v1884_v8  ;;  %v1812_v17 = vor.u32 %v2248_v15, %v1811_v14  ;;  %v2264_v19 = vld [vmem:[#allocation7 + $0x164] sm:$0xf0]  ;;  %v1939_v20 = vld [vmem:[#allocation7 + $0x1e0] sm:$0xf]  ;;  %v2230_v24 = vld [vmem:[#allocation7 + $0x54] sm:$0xf0] }
  0x3e   : > { %1287 = vmatpush.bf16.msra.mxu3 %v1948_v12  ;;  %v1876_v21 = vor.u32 %v2264_v19, %v1875_v18  ;;  %v2280_v22 = vld [vmem:[#allocation7 + $0x1e4] sm:$0xf0]  ;;  %v1803_v26 = vld [vmem:[#allocation7 + $0xd0] sm:$0xf]  ;;  %v2246_v27 = vld [vmem:[#allocation7 + $0xd4] sm:$0xf0]  ;;  %v1740_v29 = vor.u32 %v2230_v24, %v1739_v23 }
  0x3f   : > { %v1940_v25 = vor.u32 %v2280_v22, %v1939_v20  ;;  %v1867_v28 = vld [vmem:[#allocation7 + $0x150] sm:$0xf]  ;;  %1249 = vmatpush.bf16.msra.mxu0 %v1748_v16  ;;  %v2262_v30 = vld [vmem:[#allocation7 + $0x154] sm:$0xf0]  ;;  %v1804_v33 = vor.u32 %v2246_v27, %v1803_v26  ;;  %v1731_v35 = vld [vmem:[#allocation7 + $0x40] sm:$0xf] }
  0x40   : > { %v1931_v31 = vld [vmem:[#allocation7 + $0x1d0] sm:$0xf]  ;;  %v2278_v32 = vld [vmem:[#allocation7 + $0x1d4] sm:$0xf0]  ;;  %1262 = vmatpush.bf16.msra.mxu1 %v1812_v17  ;;  %v1868_v34 = vor.u32 %v2262_v30, %v1867_v28  ;;  %v2228_v36 = vld [vmem:[#allocation7 + $0x44] sm:$0xf0] }
  0x41   : > { %1275 = vmatpush.bf16.msra.mxu2 %v1876_v21  ;;  %v1795_v37 = vld [vmem:[#allocation7 + $0xc0] sm:$0xf]  ;;  %v1932_v38 = vor.u32 %v2278_v32, %v1931_v31  ;;  %v2244_v39 = vld [vmem:[#allocation7 + $0xc4] sm:$0xf0]  ;;  %v1732_v44 = vor.u32 %v2228_v36, %v1731_v35  ;;  %v1723_v47 = vld [vmem:[#allocation7 + $0x30] sm:$0xf] }
  0x42   : > { %1288 = vmatpush.bf16.msra.mxu3 %v1940_v25  ;;  %v1859_v40 = vld [vmem:[#allocation7 + $0x140] sm:$0xf]  ;;  %v2260_v41 = vld [vmem:[#allocation7 + $0x144] sm:$0xf0]  ;;  %v1796_v45 = vor.u32 %v2244_v39, %v1795_v37  ;;  %v2226_v48 = vld [vmem:[#allocation7 + $0x34] sm:$0xf0] }
  0x43   : > { %v1923_v42 = vld [vmem:[#allocation7 + $0x1c0] sm:$0xf]  ;;  %v2276_v43 = vld [vmem:[#allocation7 + $0x1c4] sm:$0xf0]  ;;  %1250 = vmatpush.bf16.msra.mxu0 %v1740_v29  ;;  %v1860_v46 = vor.u32 %v2260_v41, %v1859_v40  ;;  %v1787_v49 = vld [vmem:[#allocation7 + $0xb0] sm:$0xf]  ;;  %v1724_v56 = vor.u32 %v2226_v48, %v1723_v47 }
  0x44   : > { %1263 = vmatpush.bf16.msra.mxu1 %v1804_v33  ;;  %v1924_v50 = vor.u32 %v2276_v43, %v1923_v42  ;;  %v2242_v51 = vld [vmem:[#allocation7 + $0xb4] sm:$0xf0]  ;;  %v1851_v52 = vld [vmem:[#allocation7 + $0x130] sm:$0xf]  ;;  %v1715_v59 = vld [vmem:[#allocation7 + $0x20] sm:$0xf] }
  0x45   : > { %1276 = vmatpush.bf16.msra.mxu2 %v1868_v34  ;;  %v2258_v53 = vld [vmem:[#allocation7 + $0x134] sm:$0xf0]  ;;  %v1915_v54 = vld [vmem:[#allocation7 + $0x1b0] sm:$0xf]  ;;  %v1788_v57 = vor.u32 %v2242_v51, %v1787_v49  ;;  %v2224_v60 = vld [vmem:[#allocation7 + $0x24] sm:$0xf0] }
  0x46   : > { %1289 = vmatpush.bf16.msra.mxu3 %v1932_v38  ;;  %v2274_v55 = vld [vmem:[#allocation7 + $0x1b4] sm:$0xf0]  ;;  %v1852_v58 = vor.u32 %v2258_v53, %v1851_v52  ;;  %v1779_v61 = vld [vmem:[#allocation7 + $0xa0] sm:$0xf]  ;;  %v2240_v63 = vld [vmem:[#allocation7 + $0xa4] sm:$0xf0]  ;;  %v1716_v4 = vor.u32 %v2224_v60, %v1715_v59 }
  0x47   : > { %1251 = vmatpush.bf16.msra.mxu0 %v1732_v44  ;;  %v1916_v62 = vor.u32 %v2274_v55, %v1915_v54  ;;  %v1843_v0 = vld [vmem:[#allocation7 + $0x120] sm:$0xf]  ;;  %v2256_v1 = vld [vmem:[#allocation7 + $0x124] sm:$0xf0]  ;;  %v1707_v5 = vld [vmem:[#allocation7 + $0x10] sm:$0xf]  ;;  %v1780_v6 = vor.u32 %v2240_v63, %v1779_v61 }
  0x48   : > { %1264 = vmatpush.bf16.msra.mxu1 %v1796_v45  ;;  %v1907_v2 = vld [vmem:[#allocation7 + $0x1a0] sm:$0xf]  ;;  %v2272_v3 = vld [vmem:[#allocation7 + $0x1a4] sm:$0xf0]  ;;  %v1844_v7 = vor.u32 %v2256_v1, %v1843_v0  ;;  %v2222_v8 = vld [vmem:[#allocation7 + $0x14] sm:$0xf0] }
  0x49   : > { %1277 = vmatpush.bf16.msra.mxu2 %v1860_v46  ;;  %v1771_v9 = vld [vmem:[#allocation7 + $0x90] sm:$0xf]  ;;  %v2238_v10 = vld [vmem:[#allocation7 + $0x94] sm:$0xf0]  ;;  %v1908_v11 = vor.u32 %v2272_v3, %v1907_v2  ;;  %v1699_v16 = vld [vmem:[#allocation7] sm:$0xf]  ;;  %v1708_v18 = vor.u32 %v2222_v8, %v1707_v5 }
  0x4a   : > { %1290 = vmatpush.bf16.msra.mxu3 %v1924_v50  ;;  %v1835_v12 = vld [vmem:[#allocation7 + $0x110] sm:$0xf]  ;;  %v2254_v13 = vld [vmem:[#allocation7 + $0x114] sm:$0xf0]  ;;  %v2220_v17 = vld [vmem:[#allocation7 + $0x4] sm:$0xf0]  ;;  %v1772_v23 = vor.u32 %v2238_v10, %v1771_v9 }
  0x4b   : > { %1252 = vmatpush.bf16.msra.mxu0 %v1724_v56  ;;  %v1899_v14 = vld [vmem:[#allocation7 + $0x190] sm:$0xf]  ;;  %v2270_v15 = vld [vmem:[#allocation7 + $0x194] sm:$0xf0]  ;;  %v1763_v19 = vld [vmem:[#allocation7 + $0x80] sm:$0xf]  ;;  %v1836_v24 = vor.u32 %v2254_v13, %v1835_v12  ;;  %v1700_v36 = vor.u32 %v2220_v17, %v1699_v16 }
  0x4c   : > { %1265 = vmatpush.bf16.msra.mxu1 %v1788_v57  ;;  %v2236_v20 = vld [vmem:[#allocation7 + $0x84] sm:$0xf0]  ;;  %v1827_v21 = vld [vmem:[#allocation7 + $0x100] sm:$0xf]  ;;  %v2011_v27 = vld [vmem:[#allocation7 + $0x270] sm:$0xf]  ;;  %v1900_v29 = vor.u32 %v2270_v15, %v1899_v14 }
  0x4d   : > { %1278 = vmatpush.bf16.msra.mxu2 %v1852_v58  ;;  %v2252_v22 = vld [vmem:[#allocation7 + $0x104] sm:$0xf0]  ;;  %v1891_v25 = vld [vmem:[#allocation7 + $0x180] sm:$0xf]  ;;  %v2298_v28 = vld [vmem:[#allocation7 + $0x274] sm:$0xf0]  ;;  %v1764_v41 = vor.u32 %v2236_v20, %v1763_v19 }
  0x4e   : > { %1291 = vmatpush.bf16.msra.mxu3 %v1916_v62  ;;  %v2268_v26 = vld [vmem:[#allocation7 + $0x184] sm:$0xf0]  ;;  %v2075_v30 = vld [vmem:[#allocation7 + $0x2f0] sm:$0xf]  ;;  %v2314_v31 = vld [vmem:[#allocation7 + $0x2f4] sm:$0xf0]  ;;  %v1828_v42 = vor.u32 %v2252_v22, %v1827_v21  ;;  %v2012_v50 = vor.u32 %v2298_v28, %v2011_v27 }
  0x4f   : > { %1253 = vmatpush.bf16.msra.mxu0 %v1716_v4  ;;  %v2139_v32 = vld [vmem:[#allocation7 + $0x370] sm:$0xf]  ;;  %v2330_v33 = vld [vmem:[#allocation7 + $0x374] sm:$0xf0]  ;;  %v2829_v37 = vld [vmem:[#allocation7 + $0x260] sm:$0xf]  ;;  %v1892_v49 = vor.u32 %v2268_v26, %v1891_v25  ;;  %v2076_v54 = vor.u32 %v2314_v31, %v2075_v30 }
  0x50   : > { %1266 = vmatpush.bf16.msra.mxu1 %v1780_v6  ;;  %v2203_v34 = vld [vmem:[#allocation7 + $0x3f0] sm:$0xf]  ;;  %v2346_v35 = vld [vmem:[#allocation7 + $0x3f4] sm:$0xf0]  ;;  %v2831_v38 = vld [vmem:[#allocation7 + $0x264] sm:$0xf0]  ;;  %v2140_v55 = vor.u32 %v2330_v33, %v2139_v32 }
  0x51   : > { %1279 = vmatpush.bf16.msra.mxu2 %v1844_v7  ;;  %v2833_v39 = vld [vmem:[#allocation7 + $0x2e0] sm:$0xf]  ;;  %v2835_v40 = vld [vmem:[#allocation7 + $0x2e4] sm:$0xf0]  ;;  %v2845_v47 = vld [vmem:[#allocation7 + $0x250] sm:$0xf]  ;;  %v2204_v59 = vor.u32 %v2346_v35, %v2203_v34  ;;  %v2004_v63 = vor.u32 %v2831_v38, %v2829_v37 }
  0x52   : > { %1292 = vmatpush.bf16.msra.mxu3 %v1908_v11  ;;  %v2837_v43 = vld [vmem:[#allocation7 + $0x360] sm:$0xf]  ;;  %v2839_v44 = vld [vmem:[#allocation7 + $0x364] sm:$0xf0]  ;;  %v2847_v48 = vld [vmem:[#allocation7 + $0x254] sm:$0xf0]  ;;  %v2068_v0 = vor.u32 %v2835_v40, %v2833_v39 }
  0x53   : > { %1254 = vmatpush.bf16.msra.mxu0 %v1708_v18  ;;  %v2841_v45 = vld [vmem:[#allocation7 + $0x3e0] sm:$0xf]  ;;  %v2843_v46 = vld [vmem:[#allocation7 + $0x3e4] sm:$0xf0]  ;;  %v2849_v51 = vld [vmem:[#allocation7 + $0x2d0] sm:$0xf]  ;;  %v2132_v4 = vor.u32 %v2839_v44, %v2837_v43  ;;  %v1996_v6 = vor.u32 %v2847_v48, %v2845_v47 }
  0x54   : > { %1267 = vmatpush.bf16.msra.mxu1 %v1772_v23  ;;  %v2851_v52 = vld [vmem:[#allocation7 + $0x2d4] sm:$0xf0]  ;;  %v2853_v53 = vld [vmem:[#allocation7 + $0x350] sm:$0xf]  ;;  %v2861_v60 = vld [vmem:[#allocation7 + $0x240] sm:$0xf]  ;;  %v2196_v5 = vor.u32 %v2843_v46, %v2841_v45 }
  0x55   : > { %1280 = vmatpush.bf16.msra.mxu2 %v1836_v24  ;;  %v2855_v56 = vld [vmem:[#allocation7 + $0x354] sm:$0xf0]  ;;  %v2857_v57 = vld [vmem:[#allocation7 + $0x3d0] sm:$0xf]  ;;  %v2863_v61 = vld [vmem:[#allocation7 + $0x244] sm:$0xf0]  ;;  %v2060_v10 = vor.u32 %v2851_v52, %v2849_v51 }
  0x56   : > { %1293 = vmatpush.bf16.msra.mxu3 %v1900_v29  ;;  %v2859_v58 = vld [vmem:[#allocation7 + $0x3d4] sm:$0xf0]  ;;  %v2865_v62 = vld [vmem:[#allocation7 + $0x2c0] sm:$0xf]  ;;  %v2871_v1 = vld [vmem:[#allocation7 + $0x2c4] sm:$0xf0]  ;;  %v2124_v11 = vor.u32 %v2855_v56, %v2853_v53  ;;  %v1988_v16 = vor.u32 %v2863_v61, %v2861_v60 }
  0x57   : > { %1255 = vmatpush.bf16.msra.mxu0 %v1700_v36  ;;  %v2873_v2 = vld [vmem:[#allocation7 + $0x340] sm:$0xf]  ;;  %v2875_v3 = vld [vmem:[#allocation7 + $0x344] sm:$0xf0]  ;;  %v2887_v9 = vld [vmem:[#allocation7 + $0x230] sm:$0xf]  ;;  %v2188_v12 = vor.u32 %v2859_v58, %v2857_v57  ;;  %v2052_v23 = vor.u32 %v2871_v1, %v2865_v62 }
  0x58   : > { %1268 = vmatpush.bf16.msra.mxu1 %v1764_v41  ;;  %v2883_v7 = vld [vmem:[#allocation7 + $0x3c0] sm:$0xf]  ;;  %v2885_v8 = vld [vmem:[#allocation7 + $0x3c4] sm:$0xf0]  ;;  %v2895_v13 = vld [vmem:[#allocation7 + $0x234] sm:$0xf0]  ;;  %v2116_v24 = vor.u32 %v2875_v3, %v2873_v2 }
  0x59   : > { %1281 = vmatpush.bf16.msra.mxu2 %v1828_v42  ;;  %v2897_v14 = vld [vmem:[#allocation7 + $0x2b0] sm:$0xf]  ;;  %v318_v15 = vld [vmem:[%s2819_s25 + $0x8] sm:$0xff]  ;;  %v2902_v17 = vld [vmem:[#allocation7 + $0x2b4] sm:$0xf0]  ;;  %v2180_v25 = vor.u32 %v2885_v8, %v2883_v7  ;;  %v1980_v29 = vor.u32 %v2895_v13, %v2887_v9  ;;  %s1696_s21 = sshll.u32 %s2807_s7, 6 }
  0x5a   : > { %1294 = vmatpush.bf16.msra.mxu3 %v1892_v49  ;;  %v2904_v18 = vld [vmem:[#allocation7 + $0x330] sm:$0xf]  ;;  %v2906_v19 = vld [vmem:[#allocation7 + $0x334] sm:$0xf0]  ;;  %v323_v20 = vunpack.c.l.bf16 %v318_v15  ;;  %v324_v21 = vunpack.c.h.bf16 %v318_v15  ;;  %v586_v22 = vunpack.c.l.b16 %v318_v15  ;;  %v587_v28 = vunpack.c.h.b16 %v318_v15  ;;  %v2928_v36 = vld [vmem:[#allocation7 + $0x220] sm:$0xf] }
  0x5b   : > { %1300 = vmatpush.bf16.msrb.mxu0 %v2012_v50  ;;  %v2914_v26 = vld [vmem:[#allocation7 + $0x3b0] sm:$0xf]  ;;  %v2916_v27 = vld [vmem:[#allocation7 + $0x3b4] sm:$0xf0]  ;;  %v2044_v32 = vor.u32 %v2902_v17, %v2897_v14  ;;  %v2108_v33 = vor.u32 %v2906_v19, %v2904_v18  ;;  %v2930_v37 = vld [vmem:[#allocation7 + $0x224] sm:$0xf0] }
  0x5c   : > { %1313 = vmatpush.bf16.msrb.mxu1 %v2076_v54  ;;  %v342_v30 = vand.u32 2147483647, %v323_v20  ;;  %v343_v31 = vand.u32 2147483647, %v324_v21  ;;  %v2924_v34 = vmax.f32 %v323_v20, 0.0  ;;  %v2926_v35 = vpack.c.b16 %v586_v22, %v586_v22  ;;  %v317_v40 = vld [vmem:[%s2819_s25] sm:$0xff] }
  0x5d   : > { %1326 = vmatpush.bf16.msrb.mxu2 %v2140_v55  ;;  %v2932_v38 = vld [vmem:[#allocation7 + $0x2a0] sm:$0xf]  ;;  %v2934_v39 = vld [vmem:[#allocation7 + $0x2a4] sm:$0xf0]  ;;  %v2937_v41 = vmax.f32 %v324_v21, 0.0  ;;  %v321_v46 = vunpack.c.l.bf16 %v317_v40  ;;  %v322_v49 = vunpack.c.h.bf16 %v317_v40  ;;  %v584_v50 = vunpack.c.l.b16 %v317_v40  ;;  %s3212_s8 = scalar_lea.vmem [#allocation9], %s1696_s21 }
  0x5e   : > { %1339 = vmatpush.bf16.msrb.mxu3 %v2204_v59  ;;  %3373 = vst [vmem:[#allocation21_spill] sm:$0xff] %v2926_v35  ;;  %v350_v42 = vsub.f32 0.0, %v342_v30  ;;  %v351_v43 = vsub.f32 0.0, %v343_v31  ;;  %v2939_v44 = vld [vmem:[#allocation7 + $0x320] sm:$0xf]  ;;  %1282 = vmatmul.bf16.vlgmr.msra.gmra.mxu2 %v2926_v35  ;;  %v2948_v51 = vpack.c.b16 %v587_v28, %v587_v28  ;;  %v585_v52 = vunpack.c.h.b16 %v317_v40  ;;  %s2348_s11 = sshll.u32 %s2671_s18, 6 }
  0x5f   : > { %1301 = vmatpush.bf16.msrb.mxu0 %v2004_v63  ;;  %v2941_v45 = vld [vmem:[#allocation7 + $0x324] sm:$0xf0]  ;;  %v2944_v47 = vld [vmem:[#allocation7 + $0x3a0] sm:$0xf]  ;;  %v2950_v53 = vld [vmem:[#allocation7 + $0x210] sm:$0xf]  ;;  %v2172_v59 = vor.u32 %v2916_v27, %v2914_v26  ;;  %v2967_v22 = vpack.c.b16 %v584_v50, %v584_v50  ;;  %v1972_v30 = vor.u32 %v2930_v37, %v2928_v36  ;;  %s1530_s26 = scalar_lea.hbm %s3352_s4, %s2348_s11 }
  0x60   : > { %1314 = vmatpush.bf16.msrb.mxu1 %v2068_v0  ;;  %v2946_v48 = vld [vmem:[#allocation7 + $0x3a4] sm:$0xf0]  ;;  %3374 = vst [vmem:[#allocation22_spill] sm:$0xff] %v2948_v51  ;;  %v2952_v54 = vld [vmem:[#allocation7 + $0x214] sm:$0xf0]  ;;  %v2965_v15 = vmax.f32 %v322_v49, 0.0  ;;  %1295 = vmatmul.bf16.vlgmr.msra.gmra.mxu3 %v2948_v51 }
  0x61   : > { %1327 = vmatpush.bf16.msrb.mxu2 %v2132_v4  ;;  %v2954_v55 = vld [vmem:[#allocation7 + $0x290] sm:$0xf]  ;;  %v2956_v56 = vld [vmem:[#allocation7 + $0x294] sm:$0xf0]  ;;  %v360_v63 = vmul.f32 1.442695, %v350_v42  ;;  %1256 = vmatmul.bf16.vlgmr.msra.gmra.mxu0 %v2967_v22 }
  0x62   : > { %1340 = vmatpush.bf16.msrb.mxu3 %v2196_v5  ;;  %v362_v0 = vmul.f32 1.442695, %v351_v43  ;;  %v2960_v4 = vmax.f32 %v321_v46, 0.0  ;;  %v2963_v5 = vld [vmem:[%s2819_s25 + $0x18] sm:$0xff]  ;;  %v340_v20 = vand.u32 2147483647, %v321_v46 }
  0x63   : > { %1302 = vmatpush.bf16.msrb.mxu0 %v1996_v6  ;;  %v341_v21 = vand.u32 2147483647, %v322_v49  ;;  %3375 = vst [vmem:[#allocation23_spill] sm:$0xff] %v2967_v22  ;;  %v2969_v28 = vld [vmem:[#allocation7 + $0x310] sm:$0xf]  ;;  %2435 = vpow2.f32 %v360_v63  ;;  %v590_v60 = vunpack.c.l.b16 %v2963_v5  ;;  %v591_v3 = vunpack.c.h.b16 %v2963_v5  ;;  %s1532_s27 = sshll.u32 %s3212_s8, 4  ;;  %s1533_s27 = int_to_ptr.vmem [resolvable:$true] %s1532_s27 }
  0x64   : > { %1315 = vmatpush.bf16.msrb.mxu1 %v2060_v10  ;;  %v2972_v6 = vld [vmem:[%s2819_s25 + $0x10] sm:$0xff]  ;;  %v2983_v31 = vld [vmem:[#allocation7 + $0x314] sm:$0xf0]  ;;  %2437 = vpow2.f32 %v362_v0  ;;  %v348_v58 = vsub.f32 0.0, %v340_v20  ;;  %v2993_v43 = vld [vmem:[#allocation7 + $0x200] sm:$0xf] }
  0x65   : > { %1328 = vmatpush.bf16.msrb.mxu2 %v2124_v11  ;;  %v2981_v11 = vpack.c.b16 %v585_v52, %v585_v52  ;;  %v2985_v40 = vld [vmem:[#allocation7 + $0x390] sm:$0xf]  ;;  %v2987_v42 = vld [vmem:[#allocation7 + $0x394] sm:$0xf0]  ;;  %v2995_v46 = vld [vmem:[#allocation7 + $0x204] sm:$0xf0]  ;;  %v588_v50 = vunpack.c.l.b16 %v2972_v6  ;;  %v3049_v2 = vpack.c.b16 %v590_v60, %v590_v60  ;;  %v589_v60 = vunpack.c.h.b16 %v2972_v6 }
  0x66   : > { %1341 = vmatpush.bf16.msrb.mxu3 %v2188_v12  ;;  %v349_v12 = vsub.f32 0.0, %v341_v21  ;;  %v3007_v63 = vld [vmem:[#allocation7 + $0x280] sm:$0xf]  ;;  %v3009_v0 = vld [vmem:[#allocation7 + $0x284] sm:$0xf0]  ;;  %s1534_s28 = sshll.u32 %s1530_s26, 4  ;;  %s1535_s28 = int_to_ptr.hbm [resolvable:$true] %s1534_s28 }
  0x67   : > { %3376 = vst [vmem:[#allocation24_spill] sm:$0xff] %v2981_v11  ;;  %1303 = vmatpush.bf16.msrb.mxu0 %v1988_v16  ;;  %1269 = vmatmul.bf16.vlgmr.msra.gmra.mxu1 %v2981_v11  ;;  %v3011_v20 = vld [vmem:[#allocation7 + $0x300] sm:$0xf]  ;;  %v356_v61 = vmul.f32 1.442695, %v348_v58  ;;  %v3063_v57 = vpack.c.b16 %v588_v50, %v588_v50  ;;  %v3130_v22 = vpack.c.b16 %v589_v60, %v589_v60  ;;  %s1504_s29 = scalar_lea.sflag [#allocation10], %s2807_s7 }
  0x68   : > { %1316 = vmatpush.bf16.msrb.mxu1 %v2052_v23  ;;  %v358_v16 = vmul.f32 1.442695, %v349_v12  ;;  %v3020_v21 = vld [vmem:[#allocation7 + $0x304] sm:$0xf0]  ;;  %v3035_v23 = vld [vmem:[#allocation7 + $0x380] sm:$0xf]  ;;  %v3390_v60 = vor.u32 %v2983_v31, %v2969_v28 }
  0x69   : > { %1329 = vmatpush.bf16.msrb.mxu2 %v2116_v24  ;;  %v3037_v24 = vld [vmem:[#allocation7 + $0x384] sm:$0xf0]  ;;  %v3039_v58 = vld [vmem:[#allocation7 + $0x74] sm:$0xf]  ;;  %2439 = vpow2.f32 %v356_v61  ;;  %v3043_v8 = vld [vmem:[#allocation7 + $0x78] sm:$0xf0]  ;;  %v2436_v1 = vpop.eup %2435 }
  0x6a   : > { %1342 = vmatpush.bf16.msrb.mxu3 %v2180_v25  ;;  %v3045_v25 = vld [vmem:[#allocation7 + $0xf4] sm:$0xf]  ;;  %v3047_v12 = vld [vmem:[#allocation7 + $0xf8] sm:$0xf0]  ;;  %2441 = vpow2.f32 %v358_v16  ;;  %v2438_v10 = vpop.eup %2437  ;;  %v390_v9 = vadd.f32 1.0, %v2436_v1  ;;  %v393_v13 = vmul.f32 -0.5, %v2436_v1  ;;  %v3089_v16 = vpack.c.b16 %v591_v3, %v591_v3 }
  0x6b   : > { %1304 = vmatpush.bf16.msrb.mxu0 %v1980_v29  ;;  %v3057_v7 = vld [vmem:[#allocation7 + $0x174] sm:$0xf]  ;;  %v3059_v62 = vld [vmem:[#allocation7 + $0x178] sm:$0xf0]  ;;  %v396_v29 = vand.u32 2147483647, %v2436_v1  ;;  %v3383_v3 = vor.u32 %v2934_v39, %v2932_v38  ;;  %v328_v38 = vunpack.c.h.bf16 %v2963_v5 }
  0x6c   : > { %v3061_v49 = vld [vmem:[#allocation7 + $0x1f4] sm:$0xf]  ;;  %1317 = vmatpush.bf16.msrb.mxu1 %v2044_v32  ;;  %v3074_v61 = vld [vmem:[#allocation7 + $0x1f8] sm:$0xf0]  ;;  %v399_v50 = vadd.f32 1.0, %v2438_v10  ;;  %v402_v52 = vmul.f32 -0.5, %v2438_v10  ;;  %2443 = vlog2.f32 %v390_v9  ;;  %v3381_v9 = vunpack.c.l.bf16 %v2963_v5 }
  0x6d   : > { %1330 = vmatpush.bf16.msrb.mxu2 %v2108_v33  ;;  %v405_v14 = vand.u32 2147483647, %v2438_v10  ;;  %v3081_v18 = vld [vmem:[#allocation7 + $0x64] sm:$0xf]  ;;  %v394_v19 = vadd.f32 1.0, %v393_v13  ;;  %v3397_v32 = vor.u32 %v3020_v21, %v3011_v20  ;;  %s2571_s30 = sshra.s32 %s1535_s28, 4  ;;  %s2572_s30 = int_to_ptr.hbm [resolvable:$true] %s2571_s30 }
  0x6e   : > { %1343 = vmatpush.bf16.msrb.mxu3 %v2172_v59  ;;  %vm3083_vm0 = vcmp.lt.f32.partialorder %v396_v29, 0.0004427343  ;;  %v3087_v33 = vld [vmem:[#allocation7 + $0x68] sm:$0xf0]  ;;  %2445 = vlog2.f32 %v399_v50  ;;  %v403_v26 = vadd.f32 1.0, %v402_v52  ;;  %v3102_v13 = vmax.f32 %v3381_v9, 0.0  ;;  %p2578_p10 = scmp.lt.s32.totalorder %s2572_s30, %s3352_s4 }
  0x6f   : > { %vm3091_vm1 = vcmp.lt.f32.partialorder %v405_v14, 0.0004427343  ;;  %1305 = vmatpush.bf16.msrb.mxu0 %v1972_v30  ;;  %v3098_v59 = vld [vmem:[#allocation7 + $0xe4] sm:$0xf]  ;;  %v2440_v29 = vpop.eup %2439  ;;  %v3384_v52 = vor.u32 %v2941_v45, %v2939_v44  ;;  %v3116_v30 = vld [vmem:[#allocation7 + $0xe8] sm:$0xf0]  ;;  %v395_v44 = vmul.f32 %v2436_v1, %v394_v19  ;;  %v3385_v45 = vor.u32 %v2946_v48, %v2944_v47 }
  0x70   : > { %3382 = vst [vmem:[#allocation25_spill] sm:$0xff] %v3102_v13  ;;  %1318 = vmatpush.bf16.msrb.mxu1 %v3383_v3  ;;  %v3118_v14 = vld [vmem:[#allocation7 + $0x164] sm:$0xf]  ;;  %v3120_v9 = vld [vmem:[#allocation7 + $0x168] sm:$0xf0]  ;;  %v2442_v39 = vpop.eup %2441  ;;  %v372_v3 = vadd.f32 1.0, %v2440_v29  ;;  %v404_v35 = vmul.f32 %v2438_v10, %v403_v26  ;;  %v3386_v47 = vor.u32 %v2952_v54, %v2950_v53  ;;  %v1816_v48 = vor.u32 %v3098_v59, %v3116_v30 }
  0x71   : > { %1331 = vmatpush.bf16.msrb.mxu2 %v3384_v52  ;;  %v375_v52 = vmul.f32 -0.5, %v2440_v29  ;;  %v378_v36 = vand.u32 2147483647, %v2440_v29  ;;  %v3126_v50 = vld [vmem:[#allocation7 + $0x1e4] sm:$0xf]  ;;  %v381_v37 = vadd.f32 1.0, %v2442_v39  ;;  %v3389_v10 = vor.u32 %v2956_v56, %v2954_v55 }
  0x72   : > { %1344 = vmatpush.bf16.msrb.mxu3 %v3385_v45  ;;  %v384_v17 = vmul.f32 -0.5, %v2442_v39  ;;  %v387_v11 = vand.u32 2147483647, %v2442_v39  ;;  %v3128_v51 = vld [vmem:[#allocation7 + $0x1e8] sm:$0xf0]  ;;  %2447 = vlog2.f32 %v372_v3  ;;  %v2444_v19 = vpop.eup %2443  ;;  %v1880_v53 = vor.u32 %v3118_v14, %v3120_v9  ;;  %s2573_s6 = scalar_lea.hbm %s2572_s30, 64 }
  0x73   : > { %v376_v1 = vadd.f32 1.0, %v375_v52  ;;  %1306 = vmatpush.bf16.msrb.mxu0 %v3386_v47  ;;  %vm3138_vm2 = vcmp.lt.f32.partialorder %v378_v36, 0.0004427343  ;;  %2449 = vlog2.f32 %v381_v37  ;;  %v392_v26 = vmul.f32 0.6931472, %v2444_v19  ;;  %p2574_p1 = scmp.ne.s32.totalorder %s2572_s30, %s2573_s6  ;;  %s2577_s14 = scalar_lea.hbm %s3352_s4, 128 }
  0x74   : > { %v385_v13 = vadd.f32 1.0, %v384_v17  ;;  %1319 = vmatpush.bf16.msrb.mxu1 %v3389_v10  ;;  %v2446_v54 = vpop.eup %2445  ;;  %vm3150_vm3 = vcmp.lt.f32.partialorder %v387_v11, 0.0004427343  ;;  %v3393_v17 = vor.u32 %v2987_v42, %v2985_v40  ;;  %v1944_v55 = vor.u32 %v3126_v50, %v3128_v51  ;;  %v3192_v21 = vld [vmem:[#allocation7 + $0xd4] sm:$0xf]  ;;  %p2579_p11 = scmp.lt.s32.totalorder %s2577_s14, %s2573_s6 }
  0x75   : > { %1332 = vmatpush.bf16.msrb.mxu2 %v3390_v60  ;;  %v3394_v56 = vunpack.c.l.bf16 %v2963_v5  ;;  %v401_v31 = vmul.f32 0.6931472, %v2446_v54  ;;  %v377_v37 = vmul.f32 %v2440_v29, %v376_v1  ;;  %v347_v3 = vand.u32 2147483647, %v328_v38  ;;  %v3194_v10 = vld [vmem:[#allocation7 + $0xd8] sm:$0xf0]  ;;  %p2575_p3 = pnand %p2574_p1, %p2780_p4 }
  0x76   : > { %1345 = vmatpush.bf16.msrb.mxu3 %v3393_v17  ;;  %v325_v52 = vunpack.c.l.bf16 %v2972_v6  ;;  %v398_v11 = vsel %vm3083_vm0, %v395_v44, %v392_v26  ;;  %v3395_v47 = vor.u32 %v2995_v46, %v2993_v43  ;;  %v3167_v40 = vmax.f32 %v328_v38, 0.0  ;;  %v3181_v38 = vld [vmem:[#allocation7 + $0x54] sm:$0xf]  ;;  %v3183_v44 = vld [vmem:[#allocation7 + $0x58] sm:$0xf0]  ;;  %p2580_p12 = por %p2579_p11, %p2578_p10 }
  0x77   : > { %v346_v28 = vand.u32 2147483647, %v3394_v56  ;;  %v326_v19 = vunpack.c.h.bf16 %v2972_v6  ;;  %v407_v5 = vsel %vm3091_vm1, %v404_v35, %v401_v31  ;;  %v446_v29 = vadd.f32 %v398_v11, %v2924_v34  ;;  %v3196_v60 = vld [vmem:[#allocation7 + $0x154] sm:$0xf]  ;;  %v3198_v54 = vld [vmem:[#allocation7 + $0x158] sm:$0xf0]  ;;  %p2576_p9 = pneg %p2575_p3 }
  0x78   : > { %1307 = vmatpush.bf16.msrb.mxu0 %v3395_v47  ;;  %v3396_v1 = vor.u32 %v3009_v0, %v3007_v63  ;;  %v355_v43 = vsub.f32 0.0, %v347_v3  ;;  %v3179_v46 = vmax.f32 %v325_v52, 0.0  ;;  %v2448_v6 = vpop.eup %2447  ;;  %v447_v35 = vadd.f32 %v407_v5, %v2937_v41  ;;  %v2259_v47 = vld [vmem:[#allocation7 + $0x144] sm:$0xf]  ;;  %v1861_v59 = vld [vmem:[#allocation7 + $0x148] sm:$0xf0] }
  0x79   : > { %v354_v42 = vsub.f32 0.0, %v346_v28  ;;  %1333 = vmatpush.bf16.msrb.mxu2 %v3397_v32  ;;  %v386_v27 = vmul.f32 %v2442_v39, %v385_v13  ;;  %v3398_v34 = vor.u32 %v3037_v24, %v3035_v23  ;;  %v3399_v63 = vor.u32 %v3039_v58, %v3043_v8  ;;  %v2450_v41 = vpop.eup %2449  ;;  %v2277_v39 = vld [vmem:[#allocation7 + $0x1d4] sm:$0xf]  ;;  %v1933_v28 = vld [vmem:[#allocation7 + $0x1d8] sm:$0xf0]  ;;  %1484 = vst [vmem:[%s3212_s8 + $0x10] sm:$0xff] %v446_v29  ;;  %p2581_p13 = pnand %p2580_p12, %p2576_p9 }
  0x7a   : > { %1320 = vmatpush.bf16.msrb.mxu1 %v3396_v1  ;;  %v344_v20 = vand.u32 2147483647, %v325_v52  ;;  %v374_v13 = vmul.f32 0.6931472, %v2448_v6  ;;  %v3400_v23 = vor.u32 %v3045_v25, %v3047_v12  ;;  %v3401_v24 = vor.u32 %v3057_v7, %v3059_v62  ;;  %v2227_v25 = vld [vmem:[#allocation7 + $0x44] sm:$0xf] }
  0x7b   : > { %1346 = vmatpush.bf16.msrb.mxu3 %v3398_v34  ;;  %v368_v0 = vmul.f32 1.442695, %v354_v42  ;;  %v370_v58 = vmul.f32 1.442695, %v355_v43  ;;  %v345_v8 = vand.u32 2147483647, %v326_v19  ;;  %v3402_v17 = vor.u32 %v3061_v49, %v3074_v61  ;;  %1308 = vmatmul.bf16.vlgmr.msrb.gmra.mxu0 %v3063_v57 }
  0x7c   : > { %1352 = vmatpush.bf16.msra.mxu0 %v3399_v63  ;;  %v383_v26 = vmul.f32 0.6931472, %v2450_v41  ;;  %1334 = vmatmul.bf16.vlgmr.msrb.gmra.mxu2 %v3049_v2  ;;  %v352_v56 = vsub.f32 0.0, %v344_v20  ;;  %v380_v62 = vsel %vm3138_vm2, %v377_v37, %v374_v13  ;;  %v1744_v49 = vor.u32 %v3181_v38, %v3183_v44  ;;  %v1733_v12 = vld [vmem:[#allocation7 + $0x48] sm:$0xf0]  ;;  %1485 = vst [vmem:[%s3212_s8 + $0x18] sm:$0xff] %v447_v35 }
  0x7d   : > { %1378 = vmatpush.bf16.msra.mxu2 %v3401_v24  ;;  %2451 = vpow2.f32 %v368_v0  ;;  %v353_v7 = vsub.f32 0.0, %v345_v8  ;;  %v444_v31 = vadd.f32 %v380_v62, %v2960_v4  ;;  %v3403_v45 = vor.u32 %v3081_v18, %v3087_v33  ;;  %v2243_v52 = vld [vmem:[#allocation7 + $0xc4] sm:$0xf]  ;;  %v1797_v33 = vld [vmem:[#allocation7 + $0xc8] sm:$0xf0]  ;;  %1321 = vmatmul.bf16.vlgmr.msrb.gmra.mxu1 %v3130_v22 }
  0x7e   : > { %1365 = vmatpush.bf16.msra.mxu1 %v3400_v23  ;;  %2453 = vpow2.f32 %v370_v58  ;;  %1347 = vmatmul.bf16.vlgmr.msrb.gmra.mxu3 %v3089_v16  ;;  %v389_v61 = vsel %vm3150_vm3, %v386_v27, %v383_v26  ;;  %v3228_v37 = vmax.f32 %v326_v19, 0.0  ;;  %v364_v3 = vmul.f32 1.442695, %v352_v56  ;;  %v2275_v30 = vld [vmem:[#allocation7 + $0x1c4] sm:$0xf] }
  0x7f   : > { %1391 = vmatpush.bf16.msra.mxu3 %v3402_v17  ;;  %v445_v11 = vadd.f32 %v389_v61, %v2965_v15  ;;  %v366_v36 = vmul.f32 1.442695, %v353_v7  ;;  %v1808_v4 = vor.u32 %v3192_v21, %v3194_v10  ;;  %v1872_v18 = vor.u32 %v3196_v60, %v3198_v54  ;;  %v1925_v14 = vld [vmem:[#allocation7 + $0x1c8] sm:$0xf0]  ;;  %v2225_v9 = vld [vmem:[#allocation7 + $0x34] sm:$0xf]  ;;  %1482 = vst [vmem:[%s3212_s8] sm:$0xff] %v444_v31 }
  0x80   : > { %1353 = vmatpush.bf16.msra.mxu0 %v3403_v45  ;;  %2455 = vpow2.f32 %v364_v3  ;;  %v1936_v15 = vor.u32 %v2277_v39, %v1933_v28  ;;  %v1736_v19 = vor.u32 %v2227_v25, %v1733_v12  ;;  %v1800_v5 = vor.u32 %v2243_v52, %v1797_v33  ;;  %v1789_v29 = vld [vmem:[#allocation7 + $0xb8] sm:$0xf0]  ;;  %v2257_v51 = vld [vmem:[#allocation7 + $0x134] sm:$0xf]  ;;  %v2223_v13 = vld [vmem:[#allocation7 + $0x24] sm:$0xf] }
  0x81   : > { %1379 = vmatpush.bf16.msra.mxu2 %v1880_v53  ;;  %2457 = vpow2.f32 %v366_v36  ;;  %v2241_v53 = vld [vmem:[#allocation7 + $0xb4] sm:$0xf]  ;;  %v1853_v50 = vld [vmem:[#allocation7 + $0x138] sm:$0xf0]  ;;  %1483 = vst [vmem:[%s3212_s8 + $0x8] sm:$0xff] %v445_v11  ;;  %v1864_v38 = vor.u32 %v2259_v47, %v1861_v59  ;;  %v1928_v27 = vor.u32 %v2275_v30, %v1925_v14 }
  0x82   : > { %1366 = vmatpush.bf16.msra.mxu1 %v1816_v48  ;;  %v1725_v48 = vld [vmem:[#allocation7 + $0x38] sm:$0xf0]  ;;  %v2273_v34 = vld [vmem:[#allocation7 + $0x1b4] sm:$0xf]  ;;  %v1792_v41 = vor.u32 %v2241_v53, %v1789_v29  ;;  %v1856_v39 = vor.u32 %v2257_v51, %v1853_v50  ;;  %v1717_v26 = vld [vmem:[#allocation7 + $0x28] sm:$0xf0] }
  0x83   : > { %1392 = vmatpush.bf16.msra.mxu3 %v1944_v55  ;;  %v2452_v42 = vpop.eup %2451  ;;  %v1728_v20 = vor.u32 %v2225_v9, %v1725_v48  ;;  %v1917_v21 = vld [vmem:[#allocation7 + $0x1b8] sm:$0xf0]  ;;  %v2239_v7 = vld [vmem:[#allocation7 + $0xa4] sm:$0xf]  ;;  %v1781_v61 = vld [vmem:[#allocation7 + $0xa8] sm:$0xf0]  ;;  %v1720_v3 = vor.u32 %v2223_v13, %v1717_v26 }
  0x84   : > { %1354 = vmatpush.bf16.msra.mxu0 %v1744_v49  ;;  %v2454_v55 = vpop.eup %2453  ;;  %v426_v1 = vadd.f32 1.0, %v2452_v42  ;;  %v429_v32 = vmul.f32 -0.5, %v2452_v42  ;;  %v432_v43 = vand.u32 2147483647, %v2452_v42  ;;  %v1920_v62 = vor.u32 %v2273_v34, %v1917_v21  ;;  %v2255_v52 = vld [vmem:[#allocation7 + $0x124] sm:$0xf] }
  0x85   : > { %1380 = vmatpush.bf16.msra.mxu2 %v1872_v18  ;;  %v435_v44 = vadd.f32 1.0, %v2454_v55  ;;  %v438_v6 = vmul.f32 -0.5, %v2454_v55  ;;  %v441_v35 = vand.u32 2147483647, %v2454_v55  ;;  %v1845_v18 = vld [vmem:[#allocation7 + $0x128] sm:$0xf0] }
  0x86   : > { %1367 = vmatpush.bf16.msra.mxu1 %v1808_v4  ;;  %2459 = vlog2.f32 %v426_v1  ;;  %v430_v63 = vadd.f32 1.0, %v429_v32  ;;  %vm3247_vm4 = vcmp.lt.f32.partialorder %v432_v43, 0.0004427343  ;;  %v2456_v10 = vpop.eup %2455  ;;  %v1784_v4 = vor.u32 %v2239_v7, %v1781_v61  ;;  %v2271_v33 = vld [vmem:[#allocation7 + $0x1a4] sm:$0xf] }
  0x87   : > { %1393 = vmatpush.bf16.msra.mxu3 %v1936_v15  ;;  %2461 = vlog2.f32 %v435_v44  ;;  %v439_v60 = vadd.f32 1.0, %v438_v6  ;;  %vm3251_vm5 = vcmp.lt.f32.partialorder %v441_v35, 0.0004427343  ;;  %v2458_v23 = vpop.eup %2457  ;;  %v408_v24 = vadd.f32 1.0, %v2456_v10  ;;  %v1909_v47 = vld [vmem:[#allocation7 + $0x1a8] sm:$0xf0] }
  0x88   : > { %1355 = vmatpush.bf16.msra.mxu0 %v1736_v19  ;;  %v411_v58 = vmul.f32 -0.5, %v2456_v10  ;;  %v414_v8 = vand.u32 2147483647, %v2456_v10  ;;  %v417_v17 = vadd.f32 1.0, %v2458_v23  ;;  %v420_v56 = vmul.f32 -0.5, %v2458_v23  ;;  %v3412_v6 = vld [vmem:[#allocation25_spill] sm:$0xff] }
  0x89   : > { %1381 = vmatpush.bf16.msra.mxu2 %v1864_v38  ;;  %v423_v28 = vand.u32 2147483647, %v2458_v23  ;;  %v431_v49 = vmul.f32 %v2452_v42, %v430_v63  ;;  %2463 = vlog2.f32 %v408_v24  ;;  %v440_v36 = vmul.f32 %v2454_v55, %v439_v60  ;;  %v2221_v9 = vld [vmem:[#allocation7 + $0x14] sm:$0xf]  ;;  %v1709_v48 = vld [vmem:[#allocation7 + $0x18] sm:$0xf0] }
  0x8a   : > { %1368 = vmatpush.bf16.msra.mxu1 %v1800_v5  ;;  %v412_v25 = vadd.f32 1.0, %v411_v58  ;;  %vm3255_vm6 = vcmp.lt.f32.partialorder %v414_v8, 0.0004427343  ;;  %2465 = vlog2.f32 %v417_v17  ;;  %v421_v31 = vadd.f32 1.0, %v420_v56  ;;  %v2237_v19 = vld [vmem:[#allocation7 + $0x94] sm:$0xf] }
  0x8b   : > { %1394 = vmatpush.bf16.msra.mxu3 %v1928_v27  ;;  %vm3259_vm7 = vcmp.lt.f32.partialorder %v423_v28, 0.0004427343  ;;  %v1848_v30 = vor.u32 %v2255_v52, %v1845_v18  ;;  %v1912_v14 = vor.u32 %v2271_v33, %v1909_v47  ;;  %v1773_v5 = vld [vmem:[#allocation7 + $0x98] sm:$0xf0]  ;;  %v1712_v50 = vor.u32 %v2221_v9, %v1709_v48  ;;  %v2253_v1 = vld [vmem:[#allocation7 + $0x114] sm:$0xf] }
  0x8c   : > { %1356 = vmatpush.bf16.msra.mxu0 %v1728_v20  ;;  %v2460_v11 = vpop.eup %2459  ;;  %v413_v42 = vmul.f32 %v2456_v10, %v412_v25  ;;  %v422_v51 = vmul.f32 %v2458_v23, %v421_v31  ;;  %v1776_v55 = vor.u32 %v2237_v19, %v1773_v5  ;;  %v1837_v32 = vld [vmem:[#allocation7 + $0x118] sm:$0xf0]  ;;  %v2269_v43 = vld [vmem:[#allocation7 + $0x194] sm:$0xf]  ;;  %v2219_v63 = vld [vmem:[#allocation7 + $0x4] sm:$0xf] }
  0x8d   : > { %1382 = vmatpush.bf16.msra.mxu2 %v1856_v39  ;;  %v2462_v15 = vpop.eup %2461  ;;  %v428_v59 = vmul.f32 0.6931472, %v2460_v11  ;;  %v1840_v27 = vor.u32 %v2253_v1, %v1837_v32  ;;  %v1901_v34 = vld [vmem:[#allocation7 + $0x198] sm:$0xf0]  ;;  %v1701_v0 = vld [vmem:[#allocation7 + $0x8] sm:$0xf0] }
  0x8e   : > { %1369 = vmatpush.bf16.msra.mxu1 %v1792_v41  ;;  %v437_v53 = vmul.f32 0.6931472, %v2462_v15  ;;  %v1904_v60 = vor.u32 %v2269_v43, %v1901_v34  ;;  %v2235_v41 = vld [vmem:[#allocation7 + $0x84] sm:$0xf]  ;;  %v1765_v13 = vld [vmem:[#allocation7 + $0x88] sm:$0xf0]  ;;  %v1704_v8 = vor.u32 %v2219_v63, %v1701_v0 }
  0x8f   : > { %1395 = vmatpush.bf16.msra.mxu3 %v1920_v62  ;;  %v434_v29 = vsel %vm3247_vm4, %v431_v49, %v428_v59  ;;  %v2464_v38 = vpop.eup %2463  ;;  %v2251_v54 = vld [vmem:[#allocation7 + $0x104] sm:$0xf]  ;;  %v1829_v24 = vld [vmem:[#allocation7 + $0x108] sm:$0xf0]  ;;  %v1768_v39 = vor.u32 %v2235_v41, %v1765_v13  ;;  %v2297_v56 = vld [vmem:[#allocation7 + $0x274] sm:$0xf] }
  0x90   : > { %1357 = vmatpush.bf16.msra.mxu0 %v1720_v3  ;;  %v443_v44 = vsel %vm3251_vm5, %v440_v36, %v437_v53  ;;  %v450_v35 = vadd.f32 %v434_v29, %v3412_v6  ;;  %v2466_v20 = vpop.eup %2465  ;;  %v410_v10 = vmul.f32 0.6931472, %v2464_v38  ;;  %v2267_v26 = vld [vmem:[#allocation7 + $0x184] sm:$0xf]  ;;  %v1893_v17 = vld [vmem:[#allocation7 + $0x188] sm:$0xf0]  ;;  %v1832_v62 = vor.u32 %v2251_v54, %v1829_v24 }
  0x91   : > { %1383 = vmatpush.bf16.msra.mxu2 %v1848_v30  ;;  %v451_v21 = vadd.f32 %v443_v44, %v3167_v40  ;;  %v419_v23 = vmul.f32 0.6931472, %v2466_v20  ;;  %v2013_v7 = vld [vmem:[#allocation7 + $0x278] sm:$0xf0]  ;;  %v2313_v49 = vld [vmem:[#allocation7 + $0x2f4] sm:$0xf]  ;;  %v1896_v12 = vor.u32 %v2267_v26, %v1893_v17 }
  0x92   : > { %1370 = vmatpush.bf16.msra.mxu1 %v1784_v4  ;;  %v416_v58 = vsel %vm3255_vm6, %v413_v42, %v410_v10  ;;  %1488 = vst [vmem:[%s3212_s8 + $0x30] sm:$0xff] %v450_v35  ;;  %v2016_v61 = vor.u32 %v2297_v56, %v2013_v7  ;;  %v2077_v31 = vld [vmem:[#allocation7 + $0x2f8] sm:$0xf0]  ;;  %v2329_v3 = vld [vmem:[#allocation7 + $0x374] sm:$0xf]  ;;  %v3413_v29 = vld [vmem:[#allocation21_spill] sm:$0xff] }
  0x93   : > { %1396 = vmatpush.bf16.msra.mxu3 %v1912_v14  ;;  %v425_v40 = vsel %vm3259_vm7, %v422_v51, %v419_v23  ;;  %v448_v28 = vadd.f32 %v416_v58, %v3179_v46  ;;  %1489 = vst [vmem:[%s3212_s8 + $0x38] sm:$0xff] %v451_v21  ;;  %v2080_v52 = vor.u32 %v2313_v49, %v2077_v31  ;;  %v2141_v45 = vld [vmem:[#allocation7 + $0x378] sm:$0xf0]  ;;  %v2345_v11 = vld [vmem:[#allocation7 + $0x3f4] sm:$0xf]  ;;  %v3415_v44 = vld [vmem:[#allocation22_spill] sm:$0xff] }
  0x94   : > { %1358 = vmatpush.bf16.msra.mxu0 %v1712_v50  ;;  %v449_v25 = vadd.f32 %v425_v40, %v3228_v37  ;;  %v2205_v36 = vld [vmem:[#allocation7 + $0x3f8] sm:$0xf0]  ;;  %v2144_v46 = vor.u32 %v2329_v3, %v2141_v45  ;;  %v2295_v18 = vld [vmem:[#allocation7 + $0x264] sm:$0xf]  ;;  %v2005_v33 = vld [vmem:[#allocation7 + $0x268] sm:$0xf0] }
  0x95   : > { %1384 = vmatpush.bf16.msra.mxu2 %v1840_v27  ;;  %v2208_v4 = vor.u32 %v2345_v11, %v2205_v36  ;;  %v2311_v47 = vld [vmem:[#allocation7 + $0x2e4] sm:$0xf]  ;;  %1486 = vst [vmem:[%s3212_s8 + $0x20] sm:$0xff] %v448_v28  ;;  %v2069_v37 = vld [vmem:[#allocation7 + $0x2e8] sm:$0xf0]  ;;  %v2008_v59 = vor.u32 %v2295_v18, %v2005_v33  ;;  %v3414_v38 = vld [vmem:[#allocation23_spill] sm:$0xff] }
  0x96   : > { %1371 = vmatpush.bf16.msra.mxu1 %v1776_v55  ;;  %v2327_v15 = vld [vmem:[#allocation7 + $0x364] sm:$0xf]  ;;  %1487 = vst [vmem:[%s3212_s8 + $0x28] sm:$0xff] %v449_v25  ;;  %v2133_v30 = vld [vmem:[#allocation7 + $0x368] sm:$0xf0]  ;;  %v2072_v9 = vor.u32 %v2311_v47, %v2069_v37  ;;  %v3416_v35 = vld [vmem:[#allocation24_spill] sm:$0xff] }
  0x97   : > { %1397 = vmatpush.bf16.msra.mxu3 %v1904_v60  ;;  %v2343_v14 = vld [vmem:[#allocation7 + $0x3e4] sm:$0xf]  ;;  %v2136_v48 = vor.u32 %v2327_v15, %v2133_v30  ;;  %v2197_v53 = vld [vmem:[#allocation7 + $0x3e8] sm:$0xf0]  ;;  %v2293_v42 = vld [vmem:[#allocation7 + $0x254] sm:$0xf] }
  0x98   : > { %1359 = vmatpush.bf16.msra.mxu0 %v1704_v8  ;;  %v1997_v19 = vld [vmem:[#allocation7 + $0x258] sm:$0xf0]  ;;  %v2200_v5 = vor.u32 %v2343_v14, %v2197_v53  ;;  %v2309_v51 = vld [vmem:[#allocation7 + $0x2d4] sm:$0xf]  ;;  %v2291_v63 = vld [vmem:[#allocation7 + $0x244] sm:$0xf] }
  0x99   : > { %1385 = vmatpush.bf16.msra.mxu2 %v1832_v62  ;;  %v2061_v50 = vld [vmem:[#allocation7 + $0x2d8] sm:$0xf0]  ;;  %v2325_v55 = vld [vmem:[#allocation7 + $0x354] sm:$0xf]  ;;  %v2000_v6 = vor.u32 %v2293_v42, %v1997_v19  ;;  %v1989_v0 = vld [vmem:[#allocation7 + $0x248] sm:$0xf0] }
  0x9a   : > { %1372 = vmatpush.bf16.msra.mxu1 %v1768_v39  ;;  %v2125_v1 = vld [vmem:[#allocation7 + $0x358] sm:$0xf0]  ;;  %v2341_v32 = vld [vmem:[#allocation7 + $0x3d4] sm:$0xf]  ;;  %v2064_v27 = vor.u32 %v2309_v51, %v2061_v50  ;;  %v2307_v20 = vld [vmem:[#allocation7 + $0x2c4] sm:$0xf]  ;;  %v1992_v54 = vor.u32 %v2291_v63, %v1989_v0 }
  0x9b   : > { %1398 = vmatpush.bf16.msra.mxu3 %v1896_v12  ;;  %v2189_v43 = vld [vmem:[#allocation7 + $0x3d8] sm:$0xf0]  ;;  %1360 = vmatmul.bf16.vlgmr.msra.gmra.mxu0 %v3414_v38  ;;  %v2128_v34 = vor.u32 %v2325_v55, %v2125_v1  ;;  %v2053_v10 = vld [vmem:[#allocation7 + $0x2c8] sm:$0xf0]  ;;  %v2323_v60 = vld [vmem:[#allocation7 + $0x344] sm:$0xf] }
  0x9c   : > { %1404 = vmatpush.bf16.msrb.mxu0 %v2016_v61  ;;  %1386 = vmatmul.bf16.vlgmr.msra.gmra.mxu2 %v3413_v29  ;;  %v2192_v21 = vor.u32 %v2341_v32, %v2189_v43  ;;  %v2117_v41 = vld [vmem:[#allocation7 + $0x348] sm:$0xf0]  ;;  %v2339_v13 = vld [vmem:[#allocation7 + $0x3c4] sm:$0xf]  ;;  %v2056_v24 = vor.u32 %v2307_v20, %v2053_v10  ;;  %v2289_v8 = vld [vmem:[#allocation7 + $0x234] sm:$0xf] }
  0x9d   : > { %1430 = vmatpush.bf16.msrb.mxu2 %v2144_v46  ;;  %1373 = vmatmul.bf16.vlgmr.msra.gmra.mxu1 %v3416_v35  ;;  %v2181_v23 = vld [vmem:[#allocation7 + $0x3c8] sm:$0xf0]  ;;  %v2120_v58 = vor.u32 %v2323_v60, %v2117_v41  ;;  %v1981_v39 = vld [vmem:[#allocation7 + $0x238] sm:$0xf0]  ;;  %v2305_v26 = vld [vmem:[#allocation7 + $0x2b4] sm:$0xf] }
  0x9e   : > { %1417 = vmatpush.bf16.msrb.mxu1 %v2080_v52  ;;  %1399 = vmatmul.bf16.vlgmr.msra.gmra.mxu3 %v3415_v44  ;;  %v2184_v17 = vor.u32 %v2339_v13, %v2181_v23  ;;  %v2045_v56 = vld [vmem:[#allocation7 + $0x2b8] sm:$0xf0]  ;;  %v2321_v40 = vld [vmem:[#allocation7 + $0x334] sm:$0xf]  ;;  %v1984_v49 = vor.u32 %v2289_v8, %v1981_v39  ;;  %v2287_v61 = vld [vmem:[#allocation7 + $0x224] sm:$0xf] }
  0x9f   : > { %1443 = vmatpush.bf16.msrb.mxu3 %v2208_v4  ;;  %v2109_v28 = vld [vmem:[#allocation7 + $0x338] sm:$0xf0]  ;;  %v2337_v62 = vld [vmem:[#allocation7 + $0x3b4] sm:$0xf]  ;;  %v2048_v25 = vor.u32 %v2305_v26, %v2045_v56  ;;  %v1973_v31 = vld [vmem:[#allocation7 + $0x228] sm:$0xf0] }
  0xa0   : > { %1405 = vmatpush.bf16.msrb.mxu0 %v2008_v59  ;;  %v2173_v7 = vld [vmem:[#allocation7 + $0x3b8] sm:$0xf0]  ;;  %v2112_v12 = vor.u32 %v2321_v40, %v2109_v28  ;;  %v2303_v3 = vld [vmem:[#allocation7 + $0x2a4] sm:$0xf]  ;;  %v2037_v45 = vld [vmem:[#allocation7 + $0x2a8] sm:$0xf0]  ;;  %v1976_v18 = vor.u32 %v2287_v61, %v1973_v31 }
  0xa1   : > { %1431 = vmatpush.bf16.msrb.mxu2 %v2136_v48  ;;  %v2176_v52 = vor.u32 %v2337_v62, %v2173_v7  ;;  %v2319_v11 = vld [vmem:[#allocation7 + $0x324] sm:$0xf]  ;;  %v2101_v36 = vld [vmem:[#allocation7 + $0x328] sm:$0xf0]  ;;  %v2040_v33 = vor.u32 %v2303_v3, %v2037_v45  ;;  %v2285_v37 = vld [vmem:[#allocation7 + $0x214] sm:$0xf] }
  0xa2   : > { %1418 = vmatpush.bf16.msrb.mxu1 %v2072_v9  ;;  %v2335_v46 = vld [vmem:[#allocation7 + $0x3a4] sm:$0xf]  ;;  %v2165_v4 = vld [vmem:[#allocation7 + $0x3a8] sm:$0xf0]  ;;  %v2104_v47 = vor.u32 %v2319_v11, %v2101_v36  ;;  %v1965_v15 = vld [vmem:[#allocation7 + $0x218] sm:$0xf0] }
  0xa3   : > { %1444 = vmatpush.bf16.msrb.mxu3 %v2200_v5  ;;  %v2301_v59 = vld [vmem:[#allocation7 + $0x294] sm:$0xf]  ;;  %v2168_v30 = vor.u32 %v2335_v46, %v2165_v4  ;;  %v2029_v14 = vld [vmem:[#allocation7 + $0x298] sm:$0xf0]  ;;  %v1968_v19 = vor.u32 %v2285_v37, %v1965_v15  ;;  %v2283_v51 = vld [vmem:[#allocation7 + $0x204] sm:$0xf] }
  0xa4   : > { %1406 = vmatpush.bf16.msrb.mxu0 %v2000_v6  ;;  %v2317_v9 = vld [vmem:[#allocation7 + $0x314] sm:$0xf]  ;;  %v2093_v48 = vld [vmem:[#allocation7 + $0x318] sm:$0xf0]  ;;  %v2032_v5 = vor.u32 %v2301_v59, %v2029_v14  ;;  %v1957_v50 = vld [vmem:[#allocation7 + $0x208] sm:$0xf0] }
  0xa5   : > { %1432 = vmatpush.bf16.msrb.mxu2 %v2128_v34  ;;  %v2333_v53 = vld [vmem:[#allocation7 + $0x394] sm:$0xf]  ;;  %v2157_v42 = vld [vmem:[#allocation7 + $0x398] sm:$0xf0]  ;;  %v2096_v29 = vor.u32 %v2317_v9, %v2093_v48  ;;  %v2299_v55 = vld [vmem:[#allocation7 + $0x284] sm:$0xf]  ;;  %v1960_v35 = vor.u32 %v2283_v51, %v1957_v50 }
  0xa6   : > { %1419 = vmatpush.bf16.msrb.mxu1 %v2064_v27  ;;  %v2160_v1 = vor.u32 %v2333_v53, %v2157_v42  ;;  %v2021_v32 = vld [vmem:[#allocation7 + $0x288] sm:$0xf0]  ;;  %v2315_v43 = vld [vmem:[#allocation7 + $0x304] sm:$0xf] }
  0xa7   : > { %1445 = vmatpush.bf16.msrb.mxu3 %v2192_v21  ;;  %v2085_v38 = vld [vmem:[#allocation7 + $0x308] sm:$0xf0]  ;;  %v2331_v44 = vld [vmem:[#allocation7 + $0x384] sm:$0xf]  ;;  %v2024_v27 = vor.u32 %v2299_v55, %v2021_v32 }
  0xa8   : > { %1407 = vmatpush.bf16.msrb.mxu0 %v1992_v54  ;;  %v2149_v6 = vld [vmem:[#allocation7 + $0x388] sm:$0xf0]  ;;  %v2088_v34 = vor.u32 %v2315_v43, %v2085_v38 }
  0xa9   : > { %1433 = vmatpush.bf16.msrb.mxu2 %v2120_v58  ;;  %v2152_v63 = vor.u32 %v2331_v44, %v2149_v6 }
  0xaa   : > { %1420 = vmatpush.bf16.msrb.mxu1 %v2056_v24 }
  0xab   : > { %1446 = vmatpush.bf16.msrb.mxu3 %v2184_v17 }
  0xac   : > { %1408 = vmatpush.bf16.msrb.mxu0 %v1984_v49 }
  0xad   : > { %1434 = vmatpush.bf16.msrb.mxu2 %v2112_v12 }
  0xae   : > { %1421 = vmatpush.bf16.msrb.mxu1 %v2048_v25 }
  0xaf   : > { %1447 = vmatpush.bf16.msrb.mxu3 %v2176_v52 }
  0xb0   : > { %1409 = vmatpush.bf16.msrb.mxu0 %v1976_v18 }
  0xb1   : > { %1435 = vmatpush.bf16.msrb.mxu2 %v2104_v47 }
  0xb2   : > { %1422 = vmatpush.bf16.msrb.mxu1 %v2040_v33 }
  0xb3   : > { %1448 = vmatpush.bf16.msrb.mxu3 %v2168_v30 }
  0xb4   : > { %1410 = vmatpush.bf16.msrb.mxu0 %v1968_v19 }
  0xb5   : > { %1436 = vmatpush.bf16.msrb.mxu2 %v2096_v29 }
  0xb6   : > { %1423 = vmatpush.bf16.msrb.mxu1 %v2032_v5 }
  0xb7   : > { %1449 = vmatpush.bf16.msrb.mxu3 %v2160_v1 }
  0xb8   : > { %1411 = vmatpush.bf16.msrb.mxu0 %v1960_v35 }
  0xb9   : > { %1437 = vmatpush.bf16.msrb.mxu2 %v2088_v34 }
  0xba   : > { %1424 = vmatpush.bf16.msrb.mxu1 %v2024_v27 }
  0xbb   : > { %1450 = vmatpush.bf16.msrb.mxu3 %v2152_v63  ;;  %1412 = vmatmul.bf16.vlgmr.msrb.gmra.mxu0 %v3063_v57 }
  0xbc   : > { %1438 = vmatmul.bf16.vlgmr.msrb.gmra.mxu2 %v3049_v2 }
  0xbd   : > { %1425 = vmatmul.bf16.vlgmr.msrb.gmra.mxu1 %v3130_v22 }
  0xbe   : > { %1451 = vmatmul.bf16.vlgmr.msrb.gmra.mxu3 %v3089_v16 }
  0xbf   : > { %2584 = shalt.err (!%p2581_p13)
}
  0xc0   : > { %2358 = dma.vmem_to_hbm [thread:$0]  (%p2780_p4), %s1533_s27, 1024, %s1535_s28, %s1504_s29   ;;  %v329_v58 = vld [vmem:[%s2811_s5] sm:$0xff] }
  0xc1   : > { %v330_v17 = vunpack.c.l.bf16 %v329_v58  ;;  %s1695_s2 = sshll.u32 %s2807_s7, 4  ;;  %s2347_s5 = sshll.u32 %s2671_s18, 4  ;;  %v331_v14 = vunpack.c.h.bf16 %v329_v58 }
  0xc2   : > { %s3305_s15 = scalar_lea.vmem [#allocation8], %s1695_s2  ;;  %s1515_s21 = scalar_lea.hbm %s3351_s3, %s2347_s5 }
  0xc3   : > { %s1517_s8 = sshll.u32 %s3305_s15, 4  ;;  %s1519_s11 = sshll.u32 %s1515_s21, 4  ;;  %s1518_s8 = int_to_ptr.vmem [resolvable:$true] %s1517_s8  ;;  %s1520_s11 = int_to_ptr.hbm [resolvable:$true] %s1519_s11 }
  0xc4   : > { %s1499_s18 = scalar_lea.sflag [#allocation4], %s2807_s7  ;;  %s2599_s12 = sshra.s32 %s1520_s11, 4  ;;  %s2600_s12 = int_to_ptr.hbm [resolvable:$true] %s2599_s12 }
  0xc5   : > { %s2601_s24 = scalar_lea.hbm %s2600_s12, 16  ;;  %s2605_s28 = scalar_lea.hbm %s3351_s3, 32 }
  0xc6   : > { %p2602_p0 = scmp.ne.s32.totalorder %s2600_s12, %s2601_s24  ;;  %p2606_p8 = scmp.lt.s32.totalorder %s2600_s12, %s3351_s3 }
  0xc7   : > { %p2607_p1 = scmp.lt.s32.totalorder %s2605_s28, %s2601_s24 }
  0xc8   : > { %p2603_p2 = pnand %p2602_p0, %p2780_p4 }
  0xc9   : > { %p2608_p3 = por %p2607_p1, %p2606_p8 }
  0xca   : > { %p2604_p5 = pneg %p2603_p2 }
  0xcc   : > { %p2609_p9 = pnand %p2608_p3, %p2604_p5 }
  0xde   : > { %v1257_v22 = vpop.f32.mrf.mxu0 }
  0xe1   : > { %v1283_v2 = vpop.f32.mrf.mxu2 }
  0xe3   : > { %v1296_v16 = vpop.f32.mrf.mxu3 }
  0xe4   : > { %v1270_v57 = vpop.f32.mrf.mxu1 }
  0xe5   : > { %v1271_v10 = vadd.f32 %v1270_v57, %v1257_v22 }
  0xe6   : > { %v1259_v0 = vpop.f32.mrf.mxu0 }
  0xe7   : > { %v1284_v41 = vadd.f32 %v1283_v2, %v1271_v10 }
  0xe9   : > { %v1285_v21 = vpop.f32.mrf.mxu2  ;;  %v1297_v13 = vadd.f32 %v1296_v16, %v1284_v41 }
  0xeb   : > { %v1298_v60 = vpop.f32.mrf.mxu3 }
  0xec   : > { %v1272_v20 = vpop.f32.mrf.mxu1 }
  0xf8   : > { %v1309_v23 = vpop.f32.mrf.mxu0 }
  0xf9   : > { %v1310_v54 = vadd.f32 %v1309_v23, %v1297_v13 }
  0xfa   : > { %v1322_v24 = vpop.f32.mrf.mxu1 }
  0xfb   : > { %v1323_v8 = vadd.f32 %v1322_v24, %v1310_v54 }
  0xff   : > { %v1335_v39 = vpop.f32.mrf.mxu2 }
 0x100   : > { %v1336_v26 = vadd.f32 %v1335_v39, %v1323_v8  ;;  %v1311_v28 = vpop.f32.mrf.mxu0 }
 0x101   : > { %v1348_v56 = vpop.f32.mrf.mxu3 }
 0x102   : > { %v1349_v40 = vadd.f32 %v1348_v56, %v1336_v26  ;;  %v1324_v7 = vpop.f32.mrf.mxu1 }
 0x104   : > { %v1456_v62 = vmul.f32 %v1349_v40, %v330_v17 }
 0x106   : > { %1496 = vst [vmem:[%s3305_s15] sm:$0xff] %v1456_v62 }
 0x107   : > { %v1337_v49 = vpop.f32.mrf.mxu2 }
 0x109   : > { %v1350_v25 = vpop.f32.mrf.mxu3 }
 0x118   : > { %v1361_v12 = vpop.f32.mrf.mxu0 }
 0x11a   : > { %v1374_v61 = vpop.f32.mrf.mxu1 }
 0x11b   : > { %v1375_v46 = vadd.f32 %v1374_v61, %v1361_v12 }
 0x11f   : > { %v1387_v31 = vpop.f32.mrf.mxu2 }
 0x120   : > { %v1363_v52 = vpop.f32.mrf.mxu0  ;;  %v1388_v4 = vadd.f32 %v1387_v31, %v1375_v46 }
 0x121   : > { %v1400_v3 = vpop.f32.mrf.mxu3 }
 0x122   : > { %v1376_v45 = vpop.f32.mrf.mxu1  ;;  %v1401_v18 = vadd.f32 %v1400_v3, %v1388_v4 }
 0x127   : > { %v1389_v11 = vpop.f32.mrf.mxu2 }
 0x129   : > { %v1402_v36 = vpop.f32.mrf.mxu3 }
 0x138   : > { %v1413_v33 = vpop.f32.mrf.mxu0 }
 0x139   : > { %v1414_v37 = vadd.f32 %v1413_v33, %v1401_v18 }
 0x13a   : > { %v1426_v47 = vpop.f32.mrf.mxu1 }
 0x13b   : > { %v1427_v15 = vadd.f32 %v1426_v47, %v1414_v37 }
 0x13f   : > { %v1439_v59 = vpop.f32.mrf.mxu2 }
 0x140   : > { %v1440_v30 = vadd.f32 %v1439_v59, %v1427_v15  ;;  %v1415_v48 = vpop.f32.mrf.mxu0 }
 0x141   : > { %v1452_v9 = vpop.f32.mrf.mxu3 }
 0x142   : > { %v1428_v53 = vpop.f32.mrf.mxu1  ;;  %v1453_v42 = vadd.f32 %v1452_v9, %v1440_v30 }
 0x144   : > { %v1457_v19 = vmul.f32 %v1453_v42, %v331_v14 }
 0x146   : > { %1497 = vst [vmem:[%s3305_s15 + $0x8] sm:$0xff] %v1457_v19 }
 0x147   : > { %v1441_v5 = vpop.f32.mrf.mxu2 }
 0x149   : > { %v1454_v29 = vpop.f32.mrf.mxu3 }
 0x14a   : > { %2612 = shalt.err (!%p2609_p9)
}
 0x14b   : > { %2357 = dma.vmem_to_hbm [thread:$0]  (%p2780_p4), %s1518_s8, 256, %s1520_s11, %s1499_s18  }
 0x14c PF: > { %s3417_s7 = sld [smem:[#allocation16_spill]]  ;;  %p2373_p10 = pnand %p1684_p6, %p2788_p7 }
 0x14e   : > { %p2374_p11 = pneg %p2373_p10 }
 0x152   : > { %s1546_s9 = sand.u32 1, %s3417_s7  }
 0x153   : > { %s1547_s23 = scalar_lea.sflag [#allocation4], %s1546_s9 }
 0x154   : > { %2650 = dma.done.wait (%p2374_p11), %s1547_s23, 256  }
 0x155   : > { %2652 = vsyncadd (%p2374_p11), %s1547_s23, 4294967040  ;;  %s1557_s14 = scalar_lea.sflag [#allocation10], %s1546_s9 }
 0x156   : > { %2654 = dma.done.wait (%p2374_p11), %s1557_s14, 1024  }
 0x157   : > { %2656 = vsyncadd (%p2374_p11), %s1557_s14, 4294966272  ;;  %s27_s20 = sadd.s32 1, %s2679_s20   ;;  %s3419_s10 = sld [smem:[#allocation17_spill]] }
 0x158   : > { %p24_p12 = scmp.ge.s32.totalorder %s27_s20, 4   ;;  %s3420_s17 = sld [smem:[#allocation19_spill]] }
 0x159   : > { %s3421_s13 = sld [smem:[#allocation18_spill]]  ;;  %s3422_s15 = smov %s2663_s16 }
 0x15a   : > { %s3424_s18 = smov %s2675_s19 }
 0x15b   :  { %26 = sbr.rel (!%p24_p12) target bundleno = 12 (0xc), region = 115 }
 0x15d   : > { %s3423_s16 = smov %s3419_s10 }
 0x15f   : > { %s3425_s19 = smov %s3421_s13 }
 0x160   :  { %1563 = vsyncpa [#allocation3], 1 }
 0x161   :  { %1565 = vsyncpa [#allocation3 + $0x1], 1 }
 0x162   :  { %1566 = vsyncpa [#allocation6], 1 }
 0x163   :  { %1568 = vsyncpa [#allocation6 + $0x1], 1 }
 0x164   :  { %1569 = vsyncpa [#allocation4], 1 }
 0x165   :  { %1571 = vsyncpa [#allocation4 + $0x1], 1 }
 0x166   :  { %1572 = vsyncpa [#allocation10], 1 }
 0x167   :  { %1574 = vsyncpa [#allocation10 + $0x1], 1 }

</bundles_post_ra>
